<compile_context>
chip_gen: v5e
topology: v5e:2x2
jax: 0.10.0
libtpu: 0.0.40
codegen_flags: <defaults>
</compile_context>

<pallas_src>
import functools

import jax
import jax.numpy as jnp
from jax.experimental import pallas as pl
from jax.experimental.pallas import tpu as pltpu

TAU = 0.2          # temperature (kwarg of the InfoNCE loss in the GCL library)
EPS = 1e-12        # matches torch.nn.functional.normalize eps


def _dbc_infonce_kernel(h1_ref, h2_ref, o_ref, m_sc, l_sc, d_sc,
                        *, n_valid, block, inv_tau, mxu_dtype):
    """Grid = (row tiles, col tiles). Online logsumexp over column tiles."""
    i = pl.program_id(0)
    j = pl.program_id(1)

    @pl.when(j == 0)
    def _init():
        m_sc[...] = jnp.full(m_sc.shape, -jnp.inf, dtype=jnp.float32)
        l_sc[...] = jnp.zeros(l_sc.shape, dtype=jnp.float32)
        d_sc[...] = jnp.zeros(d_sc.shape, dtype=jnp.float32)

    h1 = h1_ref[...].astype(jnp.float32)            # [block, Dp]
    h2 = h2_ref[...].astype(jnp.float32)            # [block, Dp]

    # L2 normalization + 1/tau folded into per-row scalars (rsqrt -> EUP slot).
    s1 = jax.lax.rsqrt(
        jnp.maximum(jnp.sum(h1 * h1, axis=-1, keepdims=True), EPS * EPS)) * inv_tau
    s2 = jax.lax.rsqrt(
        jnp.maximum(jnp.sum(h2 * h2, axis=-1, keepdims=True), EPS * EPS))
    a = (h1 * s1).astype(mxu_dtype)
    b = (h2 * s2).astype(mxu_dtype)

    # A @ B.T without materializing a transpose: contract dim 1 of both operands.
    sim = jax.lax.dot_general(
        a, b, (((1,), (1,)), ((), ())),
        preferred_element_type=jnp.float32)          # [block, block] f32

    # Mask padded columns (only emitted when N is not a tile multiple).
    if n_valid % block != 0:
        col = j * block + jax.lax.broadcasted_iota(jnp.int32, sim.shape, 1)
        sim = jnp.where(col < n_valid, sim, -jnp.inf)

    # Diagonal (positive) term: only i == j tiles intersect the diagonal.
    @pl.when(i == j)
    def _diag():
        r = jax.lax.broadcasted_iota(jnp.int32, sim.shape, 0)
        c = jax.lax.broadcasted_iota(jnp.int32, sim.shape, 1)
        d_sc[...] = jnp.sum(jnp.where(r == c, sim, 0.0), axis=1, keepdims=True)

    # Streaming log-sum-exp (single exp per element; max-subtraction built in).
    m_prev = m_sc[...]
    m_new = jnp.maximum(m_prev, jnp.max(sim, axis=1, keepdims=True))
    p = jnp.exp(sim - m_new)
    l_sc[...] = l_sc[...] * jnp.exp(m_prev - m_new) + jnp.sum(p, axis=1, keepdims=True)
    m_sc[...] = m_new

    @pl.when(j == pl.num_programs(1) - 1)
    def _finalize():
        # per-row InfoNCE loss: logsumexp_row - sim[row, row]
        o_ref[...] = m_sc[...] + jnp.log(l_sc[...]) - d_sc[...]


def dual_branch_contrast_l2l(h1, h2, *, tau=TAU, block=128,
                             mxu_dtype=jnp.bfloat16):
    """Returns the scalar l1 loss (what DualBranchContrast.forward returns)."""
    assert h1.shape == h2.shape and h1.ndim == 2
    n, d = h1.shape
    # TODO(synk): PyTorch SameScaleSampler subsamples 5000 random rows when
    # N > 5000 (np.random.randint, host-side data-dependent RNG); omitted here.

    n_pad = block * pl.cdiv(n, block)           # rows / columns of sim
    d_pad = 128 * pl.cdiv(d, 128)               # contraction dim -> full MXU/lane width
    if (n_pad, d_pad) != (n, d):
        h1 = jnp.pad(h1, ((0, n_pad - n), (0, d_pad - d)))
        h2 = jnp.pad(h2, ((0, n_pad - n), (0, d_pad - d)))

    grid = (n_pad // block, n_pad // block)
    kernel = functools.partial(
        _dbc_infonce_kernel,
        n_valid=n, block=block, inv_tau=float(1.0 / tau), mxu_dtype=mxu_dtype)

    per_row = pl.pallas_call(
        kernel,
        out_shape=jax.ShapeDtypeStruct((n_pad, 1), jnp.float32),
        grid_spec=pltpu.PrefetchScalarGridSpec(
            num_scalar_prefetch=0,
            grid=grid,
            in_specs=[
                pl.BlockSpec((block, d_pad), lambda i, j: (i, 0)),   # anchor rows
                pl.BlockSpec((block, d_pad), lambda i, j: (j, 0)),   # sample rows (cols of sim)
            ],
            out_specs=pl.BlockSpec((block, 1), lambda i, j: (i, 0)),
            scratch_shapes=[pltpu.VMEM((block, 1), jnp.float32)] * 3,  # m, l, diag
        ),
        compiler_params=pltpu.CompilerParams(
            dimension_semantics=("parallel", "arbitrary")),
    )(h1, h2)

    # Padded rows carry garbage; average over the real rows only.
    return jnp.mean(per_row[:n, 0])


def _reference(h1, h2):
    """Pure-JAX reference mirroring the original torch math (masks included)."""
    h1n = h1 / jnp.maximum(jnp.linalg.norm(h1, axis=-1, keepdims=True), EPS)
    h2n = h2 / jnp.maximum(jnp.linalg.norm(h2, axis=-1, keepdims=True), EPS)
    sim = jnp.matmul(h1n, h2n.T, precision=jax.lax.Precision.HIGHEST) / TAU
    n = h1.shape[0]
    pos = jnp.eye(n, dtype=jnp.float32)
    neg = 1.0 - pos
    exp_sim = jnp.exp(sim) * (pos + neg)
    log_prob = sim - jnp.log(jnp.sum(exp_sim, axis=1, keepdims=True))
    loss = jnp.sum(log_prob * pos, axis=1) / jnp.sum(pos, axis=1)
    return -jnp.mean(loss)


if __name__ == "__main__":
    key = jax.random.PRNGKey(0)
    k1, k2 = jax.random.split(key)
    N, D = 200, 32                     # small node-count / hidden-dim
    h1 = jax.random.normal(k1, (N, D), dtype=jnp.float32)
    h2 = jax.random.normal(k2, (N, D), dtype=jnp.float32)

    ref = _reference(h1, h2)

    # Exact-parity path: f32 MXU operands.
    loss_f32 = jax.block_until_ready(
        dual_branch_contrast_l2l(h1, h2, mxu_dtype=jnp.float32))
    assert jnp.allclose(loss_f32, ref, atol=2e-3, rtol=2e-3), (loss_f32, ref)

    # Default fast path: bf16 MXU operands (f32 everywhere else).
    loss_bf16 = jax.block_until_ready(dual_branch_contrast_l2l(h1, h2))
    assert jnp.allclose(loss_bf16, ref, atol=2e-2, rtol=2e-2), (loss_bf16, ref)

    print("KERNEL_OK")
</pallas_src>

<mosaic_0001>
module attributes {stable_mosaic.version = 11 : i64} {
  func.func @_dbc_infonce_kernel(%arg0: i32, %arg1: i32, %arg2: memref<128x128xf32, #tpu.memory_space<vmem>>, %arg3: memref<128x128xf32, #tpu.memory_space<vmem>>, %arg4: memref<128x1xf32, #tpu.memory_space<vmem>>, %arg5: memref<128x1xf32, #tpu.memory_space<vmem>>, %arg6: memref<128x1xf32, #tpu.memory_space<vmem>>, %arg7: memref<128x1xf32, #tpu.memory_space<vmem>>) attributes {dimension_semantics = [#tpu.dimension_semantics<parallel>, #tpu.dimension_semantics<arbitrary>], iteration_bounds = array<i64: 2, 2>, scalar_prefetch = 0 : i64, scratch_operands = 3 : i64, tpu.core_type = #tpu.core_type<tc>, window_params = [{transform_indices = @transform_0, window_bounds = array<i64: 128, 128>}, {transform_indices = @transform_1, window_bounds = array<i64: 128, 128>}, {transform_indices = @transform_2, window_bounds = array<i64: 128, 1>}]} {
    %c0_i32 = arith.constant 0 : i32
    %0 = arith.cmpi eq, %arg1, %c0_i32 : i32
    %1 = arith.extui %0 : i1 to i32
    %c0_i32_0 = arith.constant 0 : i32
    %2 = arith.cmpi ne, %1, %c0_i32_0 : i32
    scf.if %2 {
      %cst_22 = arith.constant 0xFF800000 : f32
      %54 = vector.broadcast %cst_22 : f32 to vector<128x1xf32>
      %c0_23 = arith.constant 0 : index
      %c0_24 = arith.constant 0 : index
      %55 = vector.load %arg5[%c0_23, %c0_24] : memref<128x1xf32, #tpu.memory_space<vmem>>, vector<128x1xf32>
      tpu.vector_store %arg5[%c0_23, %c0_24], %54 {strides = array<i32>} : memref<128x1xf32, #tpu.memory_space<vmem>>, vector<128x1xf32>,
      %cst_25 = arith.constant 0.000000e+00 : f32
      %56 = vector.broadcast %cst_25 : f32 to vector<128x1xf32>
      %c0_26 = arith.constant 0 : index
      %c0_27 = arith.constant 0 : index
      %57 = vector.load %arg6[%c0_26, %c0_27] : memref<128x1xf32, #tpu.memory_space<vmem>>, vector<128x1xf32>
      tpu.vector_store %arg6[%c0_26, %c0_27], %56 {strides = array<i32>} : memref<128x1xf32, #tpu.memory_space<vmem>>, vector<128x1xf32>,
      %cst_28 = arith.constant 0.000000e+00 : f32
      %58 = vector.broadcast %cst_28 : f32 to vector<128x1xf32>
      %c0_29 = arith.constant 0 : index
      %c0_30 = arith.constant 0 : index
      %59 = vector.load %arg7[%c0_29, %c0_30] : memref<128x1xf32, #tpu.memory_space<vmem>>, vector<128x1xf32>
      tpu.vector_store %arg7[%c0_29, %c0_30], %58 {strides = array<i32>} : memref<128x1xf32, #tpu.memory_space<vmem>>, vector<128x1xf32>,
    } else {
    }
    %c0 = arith.constant 0 : index
    %c0_1 = arith.constant 0 : index
    %3 = vector.load %arg2[%c0, %c0_1] : memref<128x128xf32, #tpu.memory_space<vmem>>, vector<128x128xf32>
    %c0_2 = arith.constant 0 : index
    %c0_3 = arith.constant 0 : index
    %4 = vector.load %arg3[%c0_2, %c0_3] : memref<128x128xf32, #tpu.memory_space<vmem>>, vector<128x128xf32>
    %5 = arith.mulf %3, %3 : vector<128x128xf32>
    %cst = arith.constant dense<0.000000e+00> : vector<128xf32>
    %6 = vector.multi_reduction <add>, %5, %cst [1] : vector<128x128xf32> to vector<128xf32>
    %7 = vector.shape_cast %6 : vector<128xf32> to vector<128x1xf32>
    %cst_4 = arith.constant 1.000000e-24 : f32
    %8 = vector.broadcast %cst_4 : f32 to vector<128x1xf32>
    %9 = arith.maximumf %7, %8 : vector<128x1xf32>
    %10 = math.rsqrt %9 : vector<128x1xf32>
    %cst_5 = arith.constant 5.000000e+00 : f32
    %11 = vector.broadcast %cst_5 : f32 to vector<128x1xf32>
    %12 = arith.mulf %10, %11 : vector<128x1xf32>
    %13 = arith.mulf %4, %4 : vector<128x128xf32>
    %cst_6 = arith.constant dense<0.000000e+00> : vector<128xf32>
    %14 = vector.multi_reduction <add>, %13, %cst_6 [1] : vector<128x128xf32> to vector<128xf32>
    %15 = vector.shape_cast %14 : vector<128xf32> to vector<128x1xf32>
    %cst_7 = arith.constant 1.000000e-24 : f32
    %16 = vector.broadcast %cst_7 : f32 to vector<128x1xf32>
    %17 = arith.maximumf %15, %16 : vector<128x1xf32>
    %18 = math.rsqrt %17 : vector<128x1xf32>
    %19 = vector.broadcast %12 : vector<128x1xf32> to vector<128x128xf32>
    %20 = arith.mulf %3, %19 : vector<128x128xf32>
    %21 = vector.broadcast %18 : vector<128x1xf32> to vector<128x128xf32>
    %22 = arith.mulf %4, %21 : vector<128x128xf32>
    %cst_8 = arith.constant dense<0.000000e+00> : vector<128x128xf32>
    %23 = tpu.matmul %20, %22, %cst_8 {dimension_numbers = #tpu.dot_dimension_numbers<[1], [1], [0], [0], [0, 0, 1, 0], [], []>} : vector<128x128xf32>, vector<128x128xf32>, vector<128x128xf32> -> vector<128x128xf32>
    %c128_i32 = arith.constant 128 : i32
    %24 = arith.muli %arg1, %c128_i32 : i32
    %25 = tpu.iota {dimensions = array<i32: 1>} : vector<128x128xi32>
    %26 = vector.broadcast %24 : i32 to vector<128x128xi32>
    %27 = arith.addi %26, %25 : vector<128x128xi32>
    %c200_i32 = arith.constant 200 : i32
    %28 = vector.broadcast %c200_i32 : i32 to vector<128x128xi32>
    %29 = arith.cmpi slt, %27, %28 : vector<128x128xi32>
    %cst_9 = arith.constant 0xFF800000 : f32
    %30 = vector.broadcast %cst_9 : f32 to vector<128x128xf32>
    %31 = arith.select %29, %23, %30 : vector<128x128xi1>, vector<128x128xf32>
    %32 = arith.cmpi eq, %arg0, %arg1 : i32
    %33 = arith.extui %32 : i1 to i32
    %c0_i32_10 = arith.constant 0 : i32
    %34 = arith.cmpi ne, %33, %c0_i32_10 : i32
    scf.if %34 {
      %54 = tpu.iota {dimensions = array<i32: 0>} : vector<128x128xi32>
      %55 = tpu.iota {dimensions = array<i32: 1>} : vector<128x128xi32>
      %56 = arith.cmpi eq, %54, %55 : vector<128x128xi32>
      %cst_22 = arith.constant 0.000000e+00 : f32
      %57 = vector.broadcast %cst_22 : f32 to vector<128x128xf32>
      %58 = arith.select %56, %31, %57 : vector<128x128xi1>, vector<128x128xf32>
      %cst_23 = arith.constant dense<0.000000e+00> : vector<128xf32>
      %59 = vector.multi_reduction <add>, %58, %cst_23 [1] : vector<128x128xf32> to vector<128xf32>
      %60 = vector.shape_cast %59 : vector<128xf32> to vector<128x1xf32>
      %c0_24 = arith.constant 0 : index
      %c0_25 = arith.constant 0 : index
      %61 = vector.load %arg7[%c0_24, %c0_25] : memref<128x1xf32, #tpu.memory_space<vmem>>, vector<128x1xf32>
      tpu.vector_store %arg7[%c0_24, %c0_25], %60 {strides = array<i32>} : memref<128x1xf32, #tpu.memory_space<vmem>>, vector<128x1xf32>,
    } else {
    }
    %c0_11 = arith.constant 0 : index
    %c0_12 = arith.constant 0 : index
    %35 = vector.load %arg5[%c0_11, %c0_12] : memref<128x1xf32, #tpu.memory_space<vmem>>, vector<128x1xf32>
    %cst_13 = arith.constant dense<0xFF800000> : vector<128xf32>
    %36 = vector.multi_reduction <maximumf>, %31, %cst_13 [1] : vector<128x128xf32> to vector<128xf32>
    %37 = vector.shape_cast %36 : vector<128xf32> to vector<128x1xf32>
    %38 = arith.maximumf %35, %37 : vector<128x1xf32>
    %39 = vector.broadcast %38 : vector<128x1xf32> to vector<128x128xf32>
    %40 = arith.subf %31, %39 : vector<128x128xf32>
    %41 = math.exp %40 : vector<128x128xf32>
    %c0_14 = arith.constant 0 : index
    %c0_15 = arith.constant 0 : index
    %42 = vector.load %arg6[%c0_14, %c0_15] : memref<128x1xf32, #tpu.memory_space<vmem>>, vector<128x1xf32>
    %43 = arith.subf %35, %38 : vector<128x1xf32>
    %44 = math.exp %43 : vector<128x1xf32>
    %45 = arith.mulf %42, %44 : vector<128x1xf32>
    %cst_16 = arith.constant dense<0.000000e+00> : vector<128xf32>
    %46 = vector.multi_reduction <add>, %41, %cst_16 [1] : vector<128x128xf32> to vector<128xf32>
    %47 = vector.shape_cast %46 : vector<128xf32> to vector<128x1xf32>
    %48 = arith.addf %45, %47 : vector<128x1xf32>
    %c0_17 = arith.constant 0 : index
    %c0_18 = arith.constant 0 : index
    %49 = vector.load %arg6[%c0_17, %c0_18] : memref<128x1xf32, #tpu.memory_space<vmem>>, vector<128x1xf32>
    tpu.vector_store %arg6[%c0_17, %c0_18], %48 {strides = array<i32>} : memref<128x1xf32, #tpu.memory_space<vmem>>, vector<128x1xf32>,
    %c0_19 = arith.constant 0 : index
    %c0_20 = arith.constant 0 : index
    %50 = vector.load %arg5[%c0_19, %c0_20] : memref<128x1xf32, #tpu.memory_space<vmem>>, vector<128x1xf32>
    tpu.vector_store %arg5[%c0_19, %c0_20], %38 {strides = array<i32>} : memref<128x1xf32, #tpu.memory_space<vmem>>, vector<128x1xf32>,
    %c1_i32 = arith.constant 1 : i32
    %51 = arith.cmpi eq, %arg1, %c1_i32 : i32
    %52 = arith.extui %51 : i1 to i32
    %c0_i32_21 = arith.constant 0 : i32
    %53 = arith.cmpi ne, %52, %c0_i32_21 : i32
    scf.if %53 {
      %c0_22 = arith.constant 0 : index
      %c0_23 = arith.constant 0 : index
      %54 = vector.load %arg5[%c0_22, %c0_23] : memref<128x1xf32, #tpu.memory_space<vmem>>, vector<128x1xf32>
      %c0_24 = arith.constant 0 : index
      %c0_25 = arith.constant 0 : index
      %55 = vector.load %arg6[%c0_24, %c0_25] : memref<128x1xf32, #tpu.memory_space<vmem>>, vector<128x1xf32>
      %56 = math.log %55 : vector<128x1xf32>
      %57 = arith.addf %54, %56 : vector<128x1xf32>
      %c0_26 = arith.constant 0 : index
      %c0_27 = arith.constant 0 : index
      %58 = vector.load %arg7[%c0_26, %c0_27] : memref<128x1xf32, #tpu.memory_space<vmem>>, vector<128x1xf32>
      %59 = arith.subf %57, %58 : vector<128x1xf32>
      %c0_28 = arith.constant 0 : index
      %c0_29 = arith.constant 0 : index
      %60 = vector.load %arg4[%c0_28, %c0_29] : memref<128x1xf32, #tpu.memory_space<vmem>>, vector<128x1xf32>
      tpu.vector_store %arg4[%c0_28, %c0_29], %59 {strides = array<i32>} : memref<128x1xf32, #tpu.memory_space<vmem>>, vector<128x1xf32>,
    } else {
    }
    return
  }
  func.func @transform_0(%arg0: i32, %arg1: i32) -> (i32, i32) {
    %c0_i32 = arith.constant 0 : i32
    %c0_i32_0 = arith.constant 0 : i32
    return %arg0, %c0_i32 : i32, i32
  }
  func.func @transform_1(%arg0: i32, %arg1: i32) -> (i32, i32) {
    %c0_i32 = arith.constant 0 : i32
    %c0_i32_0 = arith.constant 0 : i32
    return %arg1, %c0_i32 : i32, i32
  }
  func.func @transform_2(%arg0: i32, %arg1: i32) -> (i32, i32) {
    %c0_i32 = arith.constant 0 : i32
    %c0_i32_0 = arith.constant 0 : i32
    return %arg0, %c0_i32 : i32, i32
  }
}

</mosaic_0001>

<bundles_post_ra>
// kernel: tpu_custom_call.1
= control target key start
LH: loop header
LB: loop body
LE: loop exit
PB: predicated region body
PF: predicated region fallthrough
CT: control target
= control target key end

     0   :  { %s3581_s0 = inlined_call_operand.hbm [shape: f32[256,128], index: 0, kind: input, shape index: {}]   ;;  %s3582_s1 = inlined_call_operand.hbm [shape: f32[256,128], index: 1, kind: input, shape index: {}]   ;;  %s3583_s2 = inlined_call_operand.vmem [shape: f32[256,1], index: 2, kind: output, shape index: {}]  }
   0x1   :  { %3588 = sst [smem:[#allocation13_spill]] %s3581_s0 }
   0x2   :  { %7 = vsyncpa [#allocation6], 0 }
   0x3   :  { %9 = vsyncpa [#allocation6 + $0x1], 0 }
   0x4   :  { %10 = vsyncpa [#allocation8], 0 }
   0x5   :  { %12 = vsyncpa [#allocation8 + $0x1], 0  ;;  %s2107_s9 = smov 0   ;;  %s2109_s10 = smov 0  }
   0x6   :  { %s2111_s11 = smov 0   ;;  %s2113_s12 = smov 0  }
   0x7   :  { %s2115_s13 = smov 0   ;;  %s2117_s14 = smov 0  }
   0x8   :  { %s2119_s15 = smov 0   ;;  %s2121_s16 = smov 0  }
   0x9   :  { %s2123_s17 = smov 0   ;;  %s2125_s18 = smov 0  }
   0xa   :  { %s2127_s19 = smov 0  }
   0xb LB: > { %s1580_s20 = sadd.s32 4294967295, %s2085_s19   ;;  %s30_s21 = sadd.s32 1, %s2081_s18  ;;  %s2085_s19 = sphi %s2127_s19, %s18_s19   ;;  %s2081_s18 = sphi %s2125_s18, %s3687_s18   ;;  %s2077_s17 = sphi %s2123_s17, %s3686_s17   ;;  %s2073_s16 = sphi %s2121_s16, %s3685_s16   ;;  %s2069_s15 = sphi %s2119_s15, %s3684_s15   ;;  %s2065_s14 = sphi %s2117_s14, %s3683_s14   ;;  %s2061_s13 = sphi %s2115_s13, %s3682_s13   ;;  %s2057_s12 = sphi %s2113_s12, %s3681_s12   ;;  %s2053_s11 = sphi %s2111_s11, %s3680_s11   ;;  %s2049_s10 = sphi %s2109_s10, %s3679_s10   ;;  %s2045_s9 = sphi %s2107_s9, %s3678_s9  }
   0xc   : > { %s37_s22 = sadd.s32 1, %s2065_s14  ;;  %p44_p0 = scmp.ne.s32.totalorder %s2065_s14, %s2061_s13 }
   0xd   : > { %p45_p1 = scmp.eq.s32.totalorder %s2085_s19, 0  ;;  %p50_p2 = scmp.ne.s32.totalorder %s2061_s13, %s2057_s12 }
   0xe   : > { %p2167_p3 = scmp.eq.s32.totalorder %s1580_s20, 0  ;;  %p1662_p5 = scmp.lt.s32.totalorder %s2085_s19, 4 }
   0xf   : > { %p46_p4 = por %p45_p1, %p44_p0  ;;  %s126_s25 = sand.u32 1, %s2065_s14  }
  0x10   : > { %p2176_p6 = por %p2167_p3, %p50_p2  ;;  %s1584_s26 = sshll.u32 %s126_s25, 7 }
  0x11   : > { %s1601_s27 = sshll.u32 %s2081_s18, 7  ;;  %s3591_s0 = sld [smem:[#allocation13_spill]] }
  0x12   : > { %s130_s3 = scalar_lea.vmem [#allocation5], %s1584_s26  ;;  %p1656_p7 = pnand %p1662_p5, %p46_p4 }
  0x13   : > { %s138_s4 = sshll.u32 %s130_s3, 4  ;;  %p1590_p8 = scmp.ge.s32.totalorder %s2085_s19, 1  ;;  %s139_s4 = int_to_ptr.vmem [resolvable:$true] %s138_s4 }
  0x14   : > { %s127_s6 = scalar_lea.sflag [#allocation6], %s126_s25  ;;  %s3584_s7 = smov 128  }
  0x15   : > { %s3585_s8 = smov 8   ;;  %p168_p9 = scmp.lt.s32.totalorder %s2085_s19, 5 }
  0x16   : > { %s27_s20 = sadd.s32 1, %s2077_s17  ;;  %s63_s26 = sadd.s32 1, %s2053_s11 }
  0x17   : > { %s135_s30 = scalar_lea.hbm %s3591_s0, %s1601_s27  ;;  %p2192_p10 = pnand %p1590_p8, %p168_p9 }
  0x18   : > { %s136_s5 = sshll.u32 %s135_s30, 4  ;;  %p28_p11 = scmp.ge.s32.totalorder %s27_s20, 2  ;;  %s137_s5 = int_to_ptr.hbm [resolvable:$true] %s136_s5 }
  0x19   : > { %1658 = dma.hbm_to_vmem [thread:$0]  (!%p1656_p7), %s137_s5, 2048, %s139_s4, %s127_s6, %s3584_s7, %s3584_s7, %s3585_s8  }
  0x1a   : > { %p70_p12 = scmp.ne.s32.totalorder %s2053_s11, %s2049_s10  ;;  %p76_p13 = scmp.ne.s32.totalorder %s2049_s10, %s2045_s9 }
  0x1b   : > { %s148_s25 = sand.u32 1, %s2053_s11   ;;  %s3689_s20 = smov (%p28_p11, %s27_s20), 0 }
  0x1c   : > { %3593 = sst [smem:[#allocation11_spill]] %s3689_s20  ;;  %s3691_s21 = smov (!%p28_p11, %s30_s21), %s2081_s18 }
  0x1d   : > { %s60_s27 = ssub.s32 %s2077_s17, %s3689_s20  ;;  %p2212_p0 = por %p70_p12, %p45_p1 }
  0x1e   : > { %p32_p2 = scmp.ge.s32.totalorder %s3691_s21, 2  ;;  %p61_p4 = scmp.eq.s32.totalorder %s60_s27, 0 }
  0x1f   : > { %p2218_p7 = por %p76_p13, %p2167_p3  ;;  %s1587_s3 = sshll.u32 %s148_s25, 7 }
  0x20   : > { %s3693_s21 = smov (%p32_p2, %s3691_s21), 0  ;;  %s1602_s4 = sshll.u32 %s2077_s17, 7 }
  0x21   : > { %3596 = sst [smem:[#allocation12_spill]] %s3693_s21  ;;  %s34_s30 = ssub.s32 %s2081_s18, %s3693_s21 }
  0x22   : > { %s2225_s29 = scalar_select %p61_p4, %s2053_s11, %s63_s26  }
  0x23   : > { %p35_p1 = scmp.eq.s32.totalorder %s34_s30, 0  ;;  %s152_s5 = scalar_lea.vmem [#allocation7], %s1587_s3 }
  0x24   : > { %s160_s6 = sshll.u32 %s152_s5, 4  ;;  %s157_s8 = scalar_lea.hbm %s3582_s1, %s1602_s4  ;;  %s161_s6 = int_to_ptr.vmem [resolvable:$true] %s160_s6 }
  0x25   : > { %s2233_s7 = scalar_select %p35_p1, %s2065_s14, %s37_s22  }
  0x26   : > { %s158_s0 = sshll.u32 %s157_s8, 4  ;;  %p1659_p3 = pnand %p1662_p5, %p2212_p0  ;;  %s159_s0 = int_to_ptr.hbm [resolvable:$true] %s158_s0 }
  0x27   : > { %s149_s26 = scalar_lea.sflag [#allocation8], %s148_s25  ;;  %s3597_s21 = smov 8  }
  0x28   : > { %s3598_s20 = smov 128   ;;  %172 = sbr.rel (%p2192_p10) target bundleno = 1068 (0x42c), region = 28 }
  0x29   : > { %1661 = dma.hbm_to_vmem [thread:$0]  (!%p1659_p3), %s159_s0, 2048, %s161_s6, %s149_s26, %s3598_s20, %s3598_s20, %s3597_s21  }
  0x2a   : > { %s174_s22 = sand.u32 (!%p2192_p10), 1, %s2061_s13  }
  0x2b   : > { %s1591_s30 = sshll.u32 (!%p2192_p10), %s174_s22, 7  ;;  %s175_s3 = scalar_lea.sflag (!%p2192_p10), [#allocation6], %s174_s22 }
  0x2c   : > { %s2248_s4 = scalar_lea.vmem (!%p2192_p10), [#allocation5], %s1591_s30 }
  0x2d   : > { %2036 = dma.done.wait (%p2176_p6), %s175_s3, 2048  }
  0x2e   : > { %2038 = vsyncadd (%p2176_p6), %s175_s3, 4294965248  ;;  %s184_s8 = sand.u32 1, %s2049_s10  }
  0x2f   : > { %s1592_s25 = sshll.u32 %s184_s8, 7  ;;  %s185_s0 = scalar_lea.sflag [#allocation8], %s184_s8 }
  0x30   : > { %s2255_s21 = scalar_lea.vmem [#allocation7], %s1592_s25 }
  0x31   : > { %2040 = dma.done.wait (%p2218_p7), %s185_s0, 2048  }
  0x32   : > { %2042 = vsyncadd (%p2218_p7), %s185_s0, 4294965248  ;;  %s1593_s12 = sshll.u32 %s2073_s16, 4  ;;  %p1595_p6 = scmp.ne.s32.totalorder %s2069_s15, 0 }
  0x33   : > { %p218_p5 = scmp.lt.s32.totalorder %s1593_s12, 31 }
  0x34   : > { %226 = sbr.rel (%p1595_p6) target bundleno = 106 (0x6a), region = 40 }
  0x35   : > { %s3695_s12 = smov (!%p218_p5, %s1593_s12), 31 }
  0x36   : > { %s1594_s20 = sshll.u32 %s3695_s12, 3 }
  0x37   : > { %s2265_s5 = scalar_lea.vmem %s3583_s2, %s1594_s20 }
  0x39   : > { %vm227_vm0 = vcmask 7168   ;;  %v2089_v0 = vmov -inf   ;;  %v2090_v1 = vmov 0.0  }
  0x3a   : > { %228 = vst.msk [vmem:[#allocation2] sm:$0xff] %vm227_vm0, %v2089_v0 }
  0x3b   : > { %229 = vst.msk [vmem:[#allocation2 + $0x8] sm:$0xff] %vm227_vm0, %v2089_v0 }
  0x3c   : > { %230 = vst.msk [vmem:[#allocation2 + $0x10] sm:$0xff] %vm227_vm0, %v2089_v0 }
  0x3d   : > { %231 = vst.msk [vmem:[#allocation2 + $0x18] sm:$0xff] %vm227_vm0, %v2089_v0 }
  0x3e   : > { %232 = vst.msk [vmem:[#allocation2 + $0x20] sm:$0xff] %vm227_vm0, %v2089_v0 }
  0x3f   : > { %233 = vst.msk [vmem:[#allocation2 + $0x28] sm:$0xff] %vm227_vm0, %v2089_v0 }
  0x40   : > { %234 = vst.msk [vmem:[#allocation2 + $0x30] sm:$0xff] %vm227_vm0, %v2089_v0 }
  0x41   : > { %235 = vst.msk [vmem:[#allocation2 + $0x38] sm:$0xff] %vm227_vm0, %v2089_v0 }
  0x42   : > { %236 = vst.msk [vmem:[#allocation2 + $0x40] sm:$0xff] %vm227_vm0, %v2089_v0 }
  0x43   : > { %237 = vst.msk [vmem:[#allocation2 + $0x48] sm:$0xff] %vm227_vm0, %v2089_v0 }
  0x44   : > { %238 = vst.msk [vmem:[#allocation2 + $0x50] sm:$0xff] %vm227_vm0, %v2089_v0 }
  0x45   : > { %239 = vst.msk [vmem:[#allocation2 + $0x58] sm:$0xff] %vm227_vm0, %v2089_v0 }
  0x46   : > { %240 = vst.msk [vmem:[#allocation2 + $0x60] sm:$0xff] %vm227_vm0, %v2089_v0 }
  0x47   : > { %241 = vst.msk [vmem:[#allocation2 + $0x68] sm:$0xff] %vm227_vm0, %v2089_v0 }
  0x48   : > { %242 = vst.msk [vmem:[#allocation2 + $0x70] sm:$0xff] %vm227_vm0, %v2089_v0 }
  0x49   : > { %243 = vst.msk [vmem:[#allocation2 + $0x78] sm:$0xff] %vm227_vm0, %v2089_v0 }
  0x4a   : > { %244 = vst.msk [vmem:[#allocation3] sm:$0xff] %vm227_vm0, %v2090_v1 }
  0x4b   : > { %245 = vst.msk [vmem:[#allocation3 + $0x8] sm:$0xff] %vm227_vm0, %v2090_v1 }
  0x4c   : > { %246 = vst.msk [vmem:[#allocation3 + $0x10] sm:$0xff] %vm227_vm0, %v2090_v1 }
  0x4d   : > { %247 = vst.msk [vmem:[#allocation3 + $0x18] sm:$0xff] %vm227_vm0, %v2090_v1 }
  0x4e   : > { %248 = vst.msk [vmem:[#allocation3 + $0x20] sm:$0xff] %vm227_vm0, %v2090_v1 }
  0x4f   : > { %249 = vst.msk [vmem:[#allocation3 + $0x28] sm:$0xff] %vm227_vm0, %v2090_v1 }
  0x50   : > { %250 = vst.msk [vmem:[#allocation3 + $0x30] sm:$0xff] %vm227_vm0, %v2090_v1 }
  0x51   : > { %251 = vst.msk [vmem:[#allocation3 + $0x38] sm:$0xff] %vm227_vm0, %v2090_v1 }
  0x52   : > { %252 = vst.msk [vmem:[#allocation3 + $0x40] sm:$0xff] %vm227_vm0, %v2090_v1 }
  0x53   : > { %253 = vst.msk [vmem:[#allocation3 + $0x48] sm:$0xff] %vm227_vm0, %v2090_v1 }
  0x54   : > { %254 = vst.msk [vmem:[#allocation3 + $0x50] sm:$0xff] %vm227_vm0, %v2090_v1 }
  0x55   : > { %255 = vst.msk [vmem:[#allocation3 + $0x58] sm:$0xff] %vm227_vm0, %v2090_v1 }
  0x56   : > { %256 = vst.msk [vmem:[#allocation3 + $0x60] sm:$0xff] %vm227_vm0, %v2090_v1 }
  0x57   : > { %257 = vst.msk [vmem:[#allocation3 + $0x68] sm:$0xff] %vm227_vm0, %v2090_v1 }
  0x58   : > { %258 = vst.msk [vmem:[#allocation3 + $0x70] sm:$0xff] %vm227_vm0, %v2090_v1 }
  0x59   : > { %259 = vst.msk [vmem:[#allocation3 + $0x78] sm:$0xff] %vm227_vm0, %v2090_v1 }
  0x5a   : > { %260 = vst.msk [vmem:[#allocation4] sm:$0xff] %vm227_vm0, %v2090_v1 }
  0x5b   : > { %261 = vst.msk [vmem:[#allocation4 + $0x8] sm:$0xff] %vm227_vm0, %v2090_v1 }
  0x5c   : > { %262 = vst.msk [vmem:[#allocation4 + $0x10] sm:$0xff] %vm227_vm0, %v2090_v1 }
  0x5d   : > { %263 = vst.msk [vmem:[#allocation4 + $0x18] sm:$0xff] %vm227_vm0, %v2090_v1 }
  0x5e   : > { %264 = vst.msk [vmem:[#allocation4 + $0x20] sm:$0xff] %vm227_vm0, %v2090_v1 }
  0x5f   : > { %265 = vst.msk [vmem:[#allocation4 + $0x28] sm:$0xff] %vm227_vm0, %v2090_v1 }
  0x60   : > { %266 = vst.msk [vmem:[#allocation4 + $0x30] sm:$0xff] %vm227_vm0, %v2090_v1 }
  0x61   : > { %267 = vst.msk [vmem:[#allocation4 + $0x38] sm:$0xff] %vm227_vm0, %v2090_v1 }
  0x62   : > { %268 = vst.msk [vmem:[#allocation4 + $0x40] sm:$0xff] %vm227_vm0, %v2090_v1 }
  0x63   : > { %269 = vst.msk [vmem:[#allocation4 + $0x48] sm:$0xff] %vm227_vm0, %v2090_v1 }
  0x64   : > { %270 = vst.msk [vmem:[#allocation4 + $0x50] sm:$0xff] %vm227_vm0, %v2090_v1 }
  0x65   : > { %271 = vst.msk [vmem:[#allocation4 + $0x58] sm:$0xff] %vm227_vm0, %v2090_v1 }
  0x66   : > { %272 = vst.msk [vmem:[#allocation4 + $0x60] sm:$0xff] %vm227_vm0, %v2090_v1 }
  0x67   : > { %273 = vst.msk [vmem:[#allocation4 + $0x68] sm:$0xff] %vm227_vm0, %v2090_v1 }
  0x68   : > { %274 = vst.msk [vmem:[#allocation4 + $0x70] sm:$0xff] %vm227_vm0, %v2090_v1 }
  0x69   : > { %275 = vst.msk [vmem:[#allocation4 + $0x78] sm:$0xff] %vm227_vm0, %v2090_v1 }
  0x6a PF: > { %v2317_v2 = vld [vmem:[%s2255_s21 + $0x78] sm:$0xff]  ;;  %v2320_v3 = vld [vmem:[%s2255_s21 + $0x68] sm:$0xff]  ;;  %v2332_v8 = vld [vmem:[%s2255_s21 + $0x70] sm:$0xff]  ;;  %s1596_s9 = sshll.u32 %s2069_s15, 7  ;;  %p1597_p8 = scmp.ne.s32.totalorder %s2073_s16, %s2069_s15 }
  0x6b   : > { %v2323_v4 = vld [vmem:[%s2255_s21 + $0x58] sm:$0xff]  ;;  %v563_v5 = vmul.f32 %v2317_v2, %v2317_v2  ;;  %v561_v6 = vmul.f32 %v2320_v3, %v2320_v3  ;;  %v2335_v9 = vld [vmem:[%s2255_s21 + $0x60] sm:$0xff]  ;;  %v2338_v10 = vld [vmem:[%s2255_s21 + $0x50] sm:$0xff]  ;;  %v562_v11 = vmul.f32 %v2332_v8, %v2332_v8 }
  0x6c   : > { %v559_v7 = vmul.f32 %v2323_v4, %v2323_v4  ;;  %v560_v12 = vmul.f32 %v2335_v9, %v2335_v9  ;;  %v558_v13 = vmul.f32 %v2338_v10, %v2338_v10  ;;  %v2347_v14 = vld [vmem:[%s2255_s21 + $0x48] sm:$0xff]  ;;  %v2350_v15 = vld [vmem:[%s2255_s21 + $0x40] sm:$0xff]  ;;  %v2353_v16 = vld [vmem:[%s2255_s21 + $0x38] sm:$0xff] }
  0x6d   : > { %594 = vadd.xlane.f32.xlu0 %v563_v5  ;;  %590 = vadd.xlane.f32.xlu1 %v561_v6  ;;  %v557_v17 = vmul.f32 %v2347_v14, %v2347_v14  ;;  %v556_v18 = vmul.f32 %v2350_v15, %v2350_v15  ;;  %v555_v19 = vmul.f32 %v2353_v16, %v2353_v16  ;;  %v2362_v20 = vld [vmem:[%s2255_s21 + $0x30] sm:$0xff]  ;;  %v2365_v21 = vld [vmem:[%s2255_s21 + $0x28] sm:$0xff]  ;;  %v2368_v22 = vld [vmem:[%s2255_s21 + $0x20] sm:$0xff] }
  0x6e   : > { %586 = vadd.xlane.f32.xlu2 %v559_v7  ;;  %v554_v23 = vmul.f32 %v2362_v20, %v2362_v20  ;;  %v553_v24 = vmul.f32 %v2365_v21, %v2365_v21  ;;  %v552_v25 = vmul.f32 %v2368_v22, %v2368_v22  ;;  %v2377_v26 = vld [vmem:[%s2255_s21 + $0x18] sm:$0xff]  ;;  %v2380_v27 = vld [vmem:[%s2255_s21 + $0x10] sm:$0xff]  ;;  %v2383_v28 = vld [vmem:[%s2255_s21 + $0x8] sm:$0xff] }
  0x6f   : > { %v551_v29 = vmul.f32 %v2377_v26, %v2377_v26  ;;  %v550_v30 = vmul.f32 %v2380_v27, %v2380_v27  ;;  %v549_v31 = vmul.f32 %v2383_v28, %v2383_v28  ;;  %v2392_v32 = vld [vmem:[%s2255_s21] sm:$0xff]  ;;  %v285_v40 = vld [vmem:[%s2248_s4 + $0x48] sm:$0xff]  ;;  %v290_v50 = vld [vmem:[%s2248_s4 + $0x70] sm:$0xff] }
  0x70   : > { %v2395_v33 = vld [vmem:[%s2248_s4 + $0x40] sm:$0xff]  ;;  %v548_v35 = vmul.f32 %v2392_v32, %v2392_v32  ;;  %v317_v43 = vmul.f32 %v285_v40, %v285_v40  ;;  %v277_v44 = vld [vmem:[%s2248_s4 + $0x8] sm:$0xff]  ;;  %v286_v51 = vld [vmem:[%s2248_s4 + $0x50] sm:$0xff]  ;;  %v322_v53 = vmul.f32 %v290_v50, %v290_v50 }
  0x71   : > { %v2398_v34 = vld [vmem:[%s2248_s4 + $0x60] sm:$0xff]  ;;  %v316_v36 = vmul.f32 %v2395_v33, %v2395_v33  ;;  %v289_v45 = vld [vmem:[%s2248_s4 + $0x68] sm:$0xff]  ;;  %v309_v47 = vmul.f32 %v277_v44, %v277_v44  ;;  %v278_v52 = vld [vmem:[%s2248_s4 + $0x10] sm:$0xff]  ;;  %v318_v54 = vmul.f32 %v286_v51, %v286_v51 }
  0x72   : > { %v320_v37 = vmul.f32 %v2398_v34, %v2398_v34  ;;  %v2407_v38 = vld [vmem:[%s2248_s4 + $0x20] sm:$0xff]  ;;  %v281_v46 = vld [vmem:[%s2248_s4 + $0x28] sm:$0xff]  ;;  %v321_v48 = vmul.f32 %v289_v45, %v289_v45  ;;  %v310_v55 = vmul.f32 %v278_v52, %v278_v52  ;;  %v287_v56 = vld [vmem:[%s2248_s4 + $0x58] sm:$0xff] }
  0x73   : > { %v2410_v39 = vld [vmem:[%s2248_s4] sm:$0xff]  ;;  %v312_v41 = vmul.f32 %v2407_v38, %v2407_v38  ;;  %v313_v49 = vmul.f32 %v281_v46, %v281_v46  ;;  %v282_v57 = vld [vmem:[%s2248_s4 + $0x30] sm:$0xff]  ;;  %v291_v58 = vld [vmem:[%s2248_s4 + $0x78] sm:$0xff]  ;;  %v319_v59 = vmul.f32 %v287_v56, %v287_v56 }
  0x74   : > { %v308_v42 = vmul.f32 %v2410_v39, %v2410_v39  ;;  %v314_v60 = vmul.f32 %v282_v57, %v282_v57  ;;  %v323_v61 = vmul.f32 %v291_v58, %v291_v58  ;;  %v283_v62 = vld [vmem:[%s2248_s4 + $0x38] sm:$0xff] }
  0x75   : > { %592 = vadd.xlane.f32.xlu0 %v562_v11  ;;  %588 = vadd.xlane.f32.xlu1 %v560_v12  ;;  %v279_v63 = vld [vmem:[%s2248_s4 + $0x18] sm:$0xff]  ;;  %v315_v0 = vmul.f32 %v283_v62, %v283_v62 }
  0x76   : > { %584 = vadd.xlane.f32.xlu2 %v558_v13  ;;  %v311_v1 = vmul.f32 %v279_v63, %v279_v63 }
  0x7d   : > { %582 = vadd.xlane.f32.xlu0 %v557_v17  ;;  %580 = vadd.xlane.f32.xlu1 %v556_v18 }
  0x7e   : > { %578 = vadd.xlane.f32.xlu2 %v555_v19 }
  0x85   : > { %576 = vadd.xlane.f32.xlu0 %v554_v23  ;;  %574 = vadd.xlane.f32.xlu1 %v553_v24 }
  0x86   : > { %572 = vadd.xlane.f32.xlu2 %v552_v25 }
  0x8d   : > { %570 = vadd.xlane.f32.xlu0 %v551_v29  ;;  %568 = vadd.xlane.f32.xlu1 %v550_v30 }
  0x8e   : > { %566 = vadd.xlane.f32.xlu2 %v549_v31 }
  0x95   : > { %564 = vadd.xlane.f32.xlu0 %v548_v35  ;;  %340 = vadd.xlane.f32.xlu1 %v316_v36 }
  0x96   : > { %348 = vadd.xlane.f32.xlu2 %v320_v37 }
  0x9d   : > { %332 = vadd.xlane.f32.xlu1 %v312_v41  ;;  %324 = vadd.xlane.f32.xlu0 %v308_v42 }
  0x9e   : > { %342 = vadd.xlane.f32.xlu2 %v317_v43 }
  0xa5   : > { %326 = vadd.xlane.f32.xlu1 %v309_v47  ;;  %350 = vadd.xlane.f32.xlu0 %v321_v48 }
  0xa6   : > { %334 = vadd.xlane.f32.xlu2 %v313_v49 }
  0xad   : > { %352 = vadd.xlane.f32.xlu1 %v322_v53  ;;  %344 = vadd.xlane.f32.xlu0 %v318_v54 }
  0xae   : > { %328 = vadd.xlane.f32.xlu2 %v310_v55 }
  0xb5   : > { %346 = vadd.xlane.f32.xlu1 %v319_v59  ;;  %336 = vadd.xlane.f32.xlu0 %v314_v60 }
  0xb6   : > { %354 = vadd.xlane.f32.xlu2 %v323_v61 }
  0xbd   : > { %338 = vadd.xlane.f32.xlu1 %v315_v0  ;;  %330 = vadd.xlane.f32.xlu0 %v311_v1 }
  0xe0   : > { %v595_v5 = vpop.xlane.xlu0 %594  ;;  %v591_v6 = vpop.xlane.xlu1 %590 }
  0xe1   : > { %v611_v7 = vmax.f32 %v595_v5, 1e-24  ;;  %v2428_v11 = vmax.f32 %v591_v6, 1e-24  ;;  %v587_v12 = vpop.xlane.xlu2 %586 }
  0xe2   : > { %v2431_v13 = vmax.f32 %v587_v12, 1e-24 }
  0xe3   : > { %1756 = vrsqrt.f32 %v611_v7  ;;  %vm768_vm2 = vweird.f32 %v611_v7  ;;  %vm748_vm4 = vweird.f32 %v2428_v11 }
  0xe4   : > { %1758 = vrsqrt.f32 %v2428_v11  ;;  %vm728_vm10 = vweird.f32 %v2431_v13 }
  0xe5   : > { %1760 = vrsqrt.f32 %v2431_v13 }
  0xe8   : > { %v593_v17 = vpop.xlane.xlu0 %592  ;;  %v589_v18 = vpop.xlane.xlu1 %588 }
  0xe9   : > { %v1757_v19 = vpop.eup %1756  ;;  %v2434_v23 = vmax.f32 %v593_v17, 1e-24  ;;  %v2436_v24 = vmax.f32 %v589_v18, 1e-24  ;;  %v585_v25 = vpop.xlane.xlu2 %584 }
  0xea   : > { %v2438_v29 = vpop.eup %1758  ;;  %v763_v30 = vmul.f32 %v1757_v19, %v611_v7  ;;  %v2440_v31 = vmax.f32 %v585_v25, 1e-24  ;;  %vm769_vm1 = vweird.f32 %v1757_v19 }
  0xeb   : > { %v743_v35 = vmul.f32 %v2438_v29, %v2428_v11  ;;  %1762 = vrsqrt.f32 %v2434_v23  ;;  %v2448_v40 = vpop.eup %1760  ;;  %vm770_vm3 = vmor %vm768_vm2, %vm769_vm1  ;;  %vm749_vm5 = vweird.f32 %v2438_v29  ;;  %vm758_vm7 = vweird.f32 %v2434_v23 }
  0xec   : > { %v764_v36 = vmul.f32 %v1757_v19, %v763_v30  ;;  %1764 = vrsqrt.f32 %v2436_v24  ;;  %v723_v47 = vmul.f32 %v2448_v40, %v2431_v13  ;;  %vm2505_vm9 = vmor %vm748_vm4, %vm749_vm5  ;;  %vm738_vm11 = vweird.f32 %v2436_v24 }
  0xed   : > { %v744_v37 = vmul.f32 %v2438_v29, %v743_v35  ;;  %1766 = vrsqrt.f32 %v2440_v31  ;;  %vm729_vm13 = vweird.f32 %v2448_v40  ;;  %vm718_vm0 = vweird.f32 %v2440_v31 }
  0xee   : > { %v765_v41 = vmul.f32 0.5, %v764_v36  ;;  %v724_v59 = vmul.f32 %v2448_v40, %v723_v47  ;;  %vm2546_vm15 = vmor %vm728_vm10, %vm729_vm13 }
  0xef   : > { %v745_v46 = vmul.f32 0.5, %v744_v37 }
  0xf0   : > { %v766_v42 = vsub.f32 1.5, %v765_v41  ;;  %v583_v43 = vpop.xlane.xlu0 %582  ;;  %v581_v44 = vpop.xlane.xlu1 %580  ;;  %v725_v18 = vmul.f32 0.5, %v724_v59 }
  0xf1   : > { %v2450_v45 = vpop.eup %1762  ;;  %v2454_v48 = vmax.f32 %v583_v43, 1e-24  ;;  %v579_v49 = vpop.xlane.xlu2 %578  ;;  %v2460_v53 = vmax.f32 %v581_v44, 1e-24  ;;  %v746_v58 = vsub.f32 1.5, %v745_v46 }
  0xf2   : > { %v2456_v50 = vpop.eup %1764  ;;  %v767_v51 = vmul.f32 %v1757_v19, %v766_v42  ;;  %v753_v52 = vmul.f32 %v2450_v45, %v2434_v23  ;;  %v2473_v0 = vmax.f32 %v579_v49, 1e-24  ;;  %vm759_vm6 = vweird.f32 %v2450_v45 }
  0xf3   : > { %v2462_v54 = vpop.eup %1766  ;;  %v733_v55 = vmul.f32 %v2456_v50, %v2436_v24  ;;  %1768 = vrsqrt.f32 %v2454_v48  ;;  %v747_v17 = vmul.f32 %v2438_v29, %v746_v58  ;;  %vm2490_vm8 = vmor %vm758_vm7, %vm759_vm6  ;;  %v726_v47 = vsub.f32 1.5, %v725_v18 }
  0xf4   : > { %v771_v56 = vsel %vm770_vm3, %v1757_v19, %v767_v51  ;;  %v754_v57 = vmul.f32 %v2450_v45, %v753_v52  ;;  %v713_v62 = vmul.f32 %v2462_v54, %v2440_v31  ;;  %1770 = vrsqrt.f32 %v2460_v53 }
  0xf5   : > { %v734_v60 = vmul.f32 %v2456_v50, %v733_v55  ;;  %v803_v1 = vmul.f32 %v771_v56, %v2317_v2  ;;  %1772 = vrsqrt.f32 %v2473_v0  ;;  %v751_v46 = vsel %vm2505_vm9, %v2438_v29, %v747_v17 }
  0xf6   : > { %v755_v61 = vmul.f32 0.5, %v754_v57  ;;  %v714_v35 = vmul.f32 %v2462_v54, %v713_v62  ;;  %vm739_vm12 = vweird.f32 %v2456_v50  ;;  %v727_v58 = vmul.f32 %v2448_v40, %v726_v47 }
  0xf7   : > { %v735_v63 = vmul.f32 0.5, %v734_v60  ;;  %804 = vmatpush.xpose.msra.mxu0 %v803_v1  ;;  %1603 = vmatpush.xpose.msra.mxu1 %v803_v1  ;;  %vm2535_vm14 = vmor %vm738_vm11, %vm739_vm12  ;;  %vm719_vm1 = vweird.f32 %v2462_v54  ;;  %vm708_vm3 = vweird.f32 %v2454_v48  ;;  %vm698_vm4 = vweird.f32 %v2460_v53 }
  0xf8   : > { %v756_v5 = vsub.f32 1.5, %v755_v61  ;;  %v577_v6 = vpop.xlane.xlu0 %576  ;;  %v575_v7 = vpop.xlane.xlu1 %574  ;;  %1604 = vmatpush.xpose.msra.mxu2 %v803_v1  ;;  %1605 = vmatpush.xpose.msra.mxu3 %v803_v1  ;;  %v715_v49 = vmul.f32 0.5, %v714_v35  ;;  %vm2577_vm2 = vmor %vm718_vm0, %vm719_vm1  ;;  %vm688_vm7 = vweird.f32 %v2473_v0 }
  0xf9   : > { %v2479_v12 = vpop.eup %1768  ;;  %v2483_v19 = vmax.f32 %v577_v6, 1e-24  ;;  %v573_v2 = vpop.xlane.xlu2 %572  ;;  %v736_v30 = vsub.f32 1.5, %v735_v63  ;;  %v2497_v37 = vmax.f32 %v575_v7, 1e-24 }
  0xfa   : > { %v757_v25 = vmul.f32 %v2450_v45, %v756_v5  ;;  %v703_v23 = vmul.f32 %v2479_v12, %v2454_v48  ;;  %v2499_v41 = vpop.eup %1770  ;;  %v2513_v44 = vmax.f32 %v573_v2, 1e-24  ;;  %v716_v63 = vsub.f32 1.5, %v715_v49 }
  0xfb   : > { %1774 = vrsqrt.f32 %v2483_v19  ;;  %v737_v11 = vmul.f32 %v2456_v50, %v736_v30  ;;  %v693_v51 = vmul.f32 %v2499_v41, %v2460_v53  ;;  %v2528_v52 = vpop.eup %1772  ;;  %vm709_vm5 = vweird.f32 %v2479_v12 }
  0xfc   : > { %v761_v43 = vsel %vm2490_vm8, %v2450_v45, %v757_v25  ;;  %1776 = vrsqrt.f32 %v2497_v37  ;;  %v704_v45 = vmul.f32 %v2479_v12, %v703_v23  ;;  %v683_v6 = vmul.f32 %v2528_v52, %v2473_v0  ;;  %vm2616_vm9 = vmor %vm708_vm3, %vm709_vm5 }
  0xfd   : > { %1778 = vrsqrt.f32 %v2513_v44  ;;  %v802_v29 = vmul.f32 %v761_v43, %v2332_v8  ;;  %v801_v8 = vmul.f32 %v751_v46, %v2320_v3  ;;  %v741_v24 = vsel %vm2535_vm14, %v2456_v50, %v737_v11 }
  0xfe   : > { %v694_v1 = vmul.f32 %v2499_v41, %v693_v51  ;;  %v705_v3 = vmul.f32 0.5, %v704_v45  ;;  %v731_v50 = vsel %vm2546_vm15, %v2448_v40, %v727_v58  ;;  %v717_v18 = vmul.f32 %v2462_v54, %v716_v63 }
  0xff   : > { %805 = vmatpush.xpose.msra.mxu0 %v802_v29  ;;  %1606 = vmatpush.xpose.msra.mxu1 %v802_v29  ;;  %v800_v25 = vmul.f32 %v741_v24, %v2335_v9  ;;  %v684_v35 = vmul.f32 %v2528_v52, %v683_v6  ;;  %vm699_vm6 = vweird.f32 %v2499_v41  ;;  %v799_v51 = vmul.f32 %v731_v50, %v2323_v4 }
 0x100   : > { %v571_v55 = vpop.xlane.xlu0 %570  ;;  %v569_v56 = vpop.xlane.xlu1 %568  ;;  %1607 = vmatpush.xpose.msra.mxu2 %v802_v29  ;;  %1608 = vmatpush.xpose.msra.mxu3 %v802_v29  ;;  %v695_v2 = vmul.f32 0.5, %v694_v1  ;;  %v706_v30 = vsub.f32 1.5, %v705_v3  ;;  %v721_v45 = vsel %vm2577_vm2, %v2462_v54, %v717_v18  ;;  %vm678_vm8 = vweird.f32 %v2483_v19  ;;  %vm2634_vm12 = vmor %vm698_vm4, %vm699_vm6 }
 0x101   : > { %v2530_v57 = vpop.eup %1774  ;;  %v2539_v60 = vmax.f32 %v571_v55, 1e-24  ;;  %v567_v61 = vpop.xlane.xlu2 %566  ;;  %v2554_v5 = vmax.f32 %v569_v56, 1e-24  ;;  %v685_v55 = vmul.f32 0.5, %v684_v35  ;;  %vm689_vm10 = vweird.f32 %v2528_v52 }
 0x102   : > { %v673_v13 = vmul.f32 %v2530_v57, %v2483_v19  ;;  %v2561_v7 = vpop.eup %1776  ;;  %v2575_v36 = vmax.f32 %v567_v61, 1e-24  ;;  %v696_v49 = vsub.f32 1.5, %v695_v2  ;;  %v707_v29 = vmul.f32 %v2479_v12, %v706_v30  ;;  %vm2666_vm15 = vmor %vm688_vm7, %vm689_vm10 }
 0x103   : > { %1780 = vrsqrt.f32 %v2539_v60  ;;  %v2563_v17 = vpop.eup %1778  ;;  %806 = vmatpush.xpose.msra.mxu0 %v801_v8  ;;  %1609 = vmatpush.xpose.msra.mxu1 %v801_v8  ;;  %v663_v23 = vmul.f32 %v2561_v7, %v2497_v37  ;;  %vm668_vm11 = vweird.f32 %v2497_v37  ;;  %v686_v6 = vsub.f32 1.5, %v685_v55 }
 0x104   : > { %1782 = vrsqrt.f32 %v2554_v5  ;;  %1610 = vmatpush.xpose.msra.mxu2 %v801_v8  ;;  %1611 = vmatpush.xpose.msra.mxu3 %v801_v8  ;;  %v674_v40 = vmul.f32 %v2530_v57, %v673_v13  ;;  %v653_v42 = vmul.f32 %v2563_v17, %v2513_v44  ;;  %v697_v24 = vmul.f32 %v2499_v41, %v696_v49 }
 0x105   : > { %1784 = vrsqrt.f32 %v2575_v36  ;;  %v664_v59 = vmul.f32 %v2561_v7, %v663_v23  ;;  %v711_v48 = vsel %vm2616_vm9, %v2479_v12, %v707_v29  ;;  %v798_v50 = vmul.f32 %v721_v45, %v2338_v10 }
 0x106   : > { %v675_v56 = vmul.f32 0.5, %v674_v40  ;;  %v654_v61 = vmul.f32 %v2563_v17, %v653_v42  ;;  %v701_v23 = vsel %vm2634_vm12, %v2499_v41, %v697_v24  ;;  %vm679_vm13 = vweird.f32 %v2530_v57 }
 0x107   : > { %807 = vmatpush.xpose.msra.mxu0 %v800_v25  ;;  %1612 = vmatpush.xpose.msra.mxu1 %v800_v25  ;;  %v665_v18 = vmul.f32 0.5, %v664_v59  ;;  %vm658_vm14 = vweird.f32 %v2513_v44  ;;  %vm2675_vm0 = vmor %vm678_vm8, %vm679_vm13  ;;  %vm669_vm1 = vweird.f32 %v2561_v7  ;;  %vm659_vm2 = vweird.f32 %v2563_v17 }
 0x108   : > { %v565_v43 = vpop.xlane.xlu0 %564  ;;  %v341_v46 = vpop.xlane.xlu1 %340  ;;  %1613 = vmatpush.xpose.msra.mxu2 %v800_v25  ;;  %1614 = vmatpush.xpose.msra.mxu3 %v800_v25  ;;  %v676_v13 = vsub.f32 1.5, %v675_v56  ;;  %v655_v2 = vmul.f32 0.5, %v654_v61  ;;  %vm648_vm3 = vweird.f32 %v2539_v60  ;;  %vm638_vm4 = vweird.f32 %v2554_v5  ;;  %vm2709_vm7 = vmor %vm668_vm11, %vm669_vm1 }
 0x109   : > { %v2585_v9 = vpop.eup %1780  ;;  %v2590_v47 = vmax.f32 %v565_v43, 1e-24  ;;  %v349_v11 = vpop.xlane.xlu2 %348  ;;  %v2605_v62 = vmax.f32 %v341_v46, 1e-24  ;;  %v687_v43 = vmul.f32 %v2528_v52, %v686_v6  ;;  %v666_v49 = vsub.f32 1.5, %v665_v18  ;;  %vm2722_vm8 = vmor %vm658_vm14, %vm659_vm2 }
 0x10a   : > { %v2599_v58 = vpop.eup %1782  ;;  %v643_v8 = vmul.f32 %v2585_v9, %v2539_v60  ;;  %v2623_v63 = vmax.f32 %v349_v11, 1e-24  ;;  %v2658_v46 = vmul.f32 %v2530_v57, %v676_v13  ;;  %v797_v11 = vmul.f32 %v711_v48, %v2347_v14 }
 0x10b   : > { %v633_v4 = vmul.f32 %v2599_v58, %v2554_v5  ;;  %1786 = vrsqrt.f32 %v2590_v47  ;;  %808 = vmatpush.xpose.msra.mxu0 %v799_v51  ;;  %1615 = vmatpush.xpose.msra.mxu1 %v799_v51  ;;  %v2625_v1 = vpop.eup %1784  ;;  %v691_v59 = vsel %vm2666_vm15, %v2528_v52, %v687_v43  ;;  %vm649_vm5 = vweird.f32 %v2585_v9 }
 0x10c   : > { %1616 = vmatpush.xpose.msra.mxu2 %v799_v51  ;;  %1617 = vmatpush.xpose.msra.mxu3 %v799_v51  ;;  %v644_v25 = vmul.f32 %v2585_v9, %v643_v8  ;;  %1788 = vrsqrt.f32 %v2605_v62  ;;  %v623_v53 = vmul.f32 %v2625_v1, %v2575_v36  ;;  %v656_v51 = vsub.f32 1.5, %v655_v2  ;;  %vm2759_vm11 = vmor %vm648_vm3, %vm649_vm5 }
 0x10d   : > { %v634_v35 = vmul.f32 %v2599_v58, %v633_v4  ;;  %1790 = vrsqrt.f32 %v2623_v63  ;;  %vm628_vm6 = vweird.f32 %v2575_v36  ;;  %v796_v61 = vmul.f32 %v701_v23, %v2350_v15 }
 0x10e   : > { %v645_v45 = vmul.f32 0.5, %v644_v25  ;;  %v624_v0 = vmul.f32 %v2625_v1, %v623_v53  ;;  %v681_v4 = vsel %vm2675_vm0, %v2530_v57, %v2658_v46  ;;  %v2703_v54 = vmul.f32 %v2561_v7, %v666_v49 }
 0x10f   : > { %809 = vmatpush.xpose.msra.mxu0 %v798_v50  ;;  %1618 = vmatpush.xpose.msra.mxu1 %v798_v50  ;;  %v635_v14 = vmul.f32 0.5, %v634_v35  ;;  %v2714_v15 = vmul.f32 %v2563_v17, %v656_v51  ;;  %vm639_vm9 = vweird.f32 %v2599_v58  ;;  %v795_v53 = vmul.f32 %v691_v59, %v2353_v16 }
 0x110   : > { %v333_v30 = vpop.xlane.xlu1 %332  ;;  %v325_v12 = vpop.xlane.xlu0 %324  ;;  %1619 = vmatpush.xpose.msra.mxu2 %v798_v50  ;;  %1620 = vmatpush.xpose.msra.mxu3 %v798_v50  ;;  %v646_v24 = vsub.f32 1.5, %v645_v45  ;;  %v625_v13 = vmul.f32 0.5, %v624_v0  ;;  %vm618_vm10 = vweird.f32 %v2590_v47  ;;  %vm2771_vm12 = vmor %vm638_vm4, %vm639_vm9  ;;  %vm629_vm13 = vweird.f32 %v2625_v1 }
 0x111   : > { %v2644_v40 = vmax.f32 %v333_v30, 1e-24  ;;  %v2646_v31 = vmax.f32 %v325_v12, 1e-24  ;;  %v343_v10 = vpop.xlane.xlu2 %342  ;;  %v2654_v42 = vpop.eup %1786  ;;  %v636_v37 = vsub.f32 1.5, %v635_v14  ;;  %v661_v23 = vsel %vm2722_vm8, %v2563_v17, %v2714_v15  ;;  %vm2805_vm2 = vmor %vm628_vm6, %vm629_vm13 }
 0x112   : > { %v2681_v55 = vmax.f32 %v343_v10, 1e-24  ;;  %v2683_v56 = vpop.eup %1788  ;;  %v613_v19 = vmul.f32 %v2654_v42, %v2590_v47  ;;  %v671_v10 = vsel %vm2709_vm7, %v2561_v7, %v2703_v54  ;;  %v647_v43 = vmul.f32 %v2585_v9, %v646_v24 }
 0x113   : > { %1792 = vrsqrt.f32 %v2644_v40  ;;  %810 = vmatpush.xpose.msra.mxu0 %v797_v11  ;;  %1621 = vmatpush.xpose.msra.mxu1 %v797_v11  ;;  %v2696_v8 = vpop.eup %1790  ;;  %v453_v44 = vmul.f32 %v2683_v56, %v2605_v62  ;;  %v637_v7 = vmul.f32 %v2599_v58, %v636_v37  ;;  %vm619_vm14 = vweird.f32 %v2654_v42 }
 0x114   : > { %1794 = vrsqrt.f32 %v2646_v31  ;;  %1622 = vmatpush.xpose.msra.mxu2 %v797_v11  ;;  %1623 = vmatpush.xpose.msra.mxu3 %v797_v11  ;;  %v614_v25 = vmul.f32 %v2654_v42, %v613_v19  ;;  %v493_v46 = vmul.f32 %v2696_v8, %v2623_v63  ;;  %v626_v11 = vsub.f32 1.5, %v625_v13  ;;  %vm2846_vm4 = vmor %vm618_vm10, %vm619_vm14 }
 0x115   : > { %1796 = vrsqrt.f32 %v2681_v55  ;;  %v454_v51 = vmul.f32 %v2683_v56, %v453_v44  ;;  %v794_v5 = vmul.f32 %v681_v4, %v2362_v20  ;;  %v651_v14 = vsel %vm2759_vm11, %v2585_v9, %v647_v43 }
 0x116   : > { %v615_v60 = vmul.f32 0.5, %v614_v25  ;;  %v494_v0 = vmul.f32 %v2696_v8, %v493_v46  ;;  %vm418_vm15 = vweird.f32 %v2644_v40  ;;  %vm378_vm0 = vweird.f32 %v2646_v31 }
 0x117   : > { %811 = vmatpush.xpose.msra.mxu0 %v796_v61  ;;  %1624 = vmatpush.xpose.msra.mxu1 %v796_v61  ;;  %v641_v54 = vsel %vm2771_vm12, %v2599_v58, %v637_v7  ;;  %v2796_v20 = vmul.f32 %v2625_v1, %v626_v11  ;;  %vm458_vm1 = vweird.f32 %v2605_v62  ;;  %v455_v24 = vmul.f32 0.5, %v454_v51 }
 0x118   : > { %v327_v48 = vpop.xlane.xlu1 %326  ;;  %v351_v3 = vpop.xlane.xlu0 %350  ;;  %1625 = vmatpush.xpose.msra.mxu2 %v796_v61  ;;  %1626 = vmatpush.xpose.msra.mxu3 %v796_v61  ;;  %v616_v58 = vsub.f32 1.5, %v615_v60  ;;  %vm498_vm3 = vweird.f32 %v2623_v63  ;;  %v793_v36 = vmul.f32 %v671_v10, %v2365_v21  ;;  %v792_v44 = vmul.f32 %v661_v23, %v2368_v22 }
 0x119   : > { %v2716_v6 = vpop.eup %1792  ;;  %v2727_v50 = vmax.f32 %v327_v48, 1e-24  ;;  %v335_v18 = vpop.xlane.xlu2 %334  ;;  %v2736_v12 = vmax.f32 %v351_v3, 1e-24  ;;  %v2836_v10 = vmul.f32 %v641_v54, %v2380_v27  ;;  %v456_v23 = vsub.f32 1.5, %v455_v24 }
 0x11a   : > { %v2729_v2 = vpop.eup %1794  ;;  %v413_v30 = vmul.f32 %v2716_v6, %v2644_v40  ;;  %v2765_v41 = vmax.f32 %v335_v18, 1e-24  ;;  %v2820_v18 = vmul.f32 0.5, %v494_v0  ;;  %v617_v22 = vmul.f32 %v2654_v42, %v616_v58 }
 0x11b   : > { %v373_v35 = vmul.f32 %v2729_v2, %v2646_v31  ;;  %1798 = vrsqrt.f32 %v2727_v50  ;;  %812 = vmatpush.xpose.msra.mxu0 %v795_v53  ;;  %1627 = vmatpush.xpose.msra.mxu1 %v795_v53  ;;  %v2778_v45 = vpop.eup %1796  ;;  %vm419_vm5 = vweird.f32 %v2716_v6  ;;  %vm379_vm6 = vweird.f32 %v2729_v2 }
 0x11c   : > { %v414_v17 = vmul.f32 %v2716_v6, %v413_v30  ;;  %1800 = vrsqrt.f32 %v2736_v12  ;;  %1628 = vmatpush.xpose.msra.mxu2 %v795_v53  ;;  %1629 = vmatpush.xpose.msra.mxu3 %v795_v53  ;;  %v463_v48 = vmul.f32 %v2778_v45, %v2681_v55  ;;  %v2826_v30 = vmul.f32 %v651_v14, %v2377_v26  ;;  %vm2876_vm9 = vmor %vm418_vm15, %vm419_vm5 }
 0x11d   : > { %v374_v29 = vmul.f32 %v2729_v2, %v373_v35  ;;  %1802 = vrsqrt.f32 %v2765_v41  ;;  %v631_v53 = vsel %vm2805_vm2, %v2625_v1, %v2796_v20  ;;  %v496_v16 = vsub.f32 1.5, %v2820_v18  ;;  %vm2891_vm10 = vmor %vm378_vm0, %vm379_vm6 }
 0x11e   : > { %v415_v9 = vmul.f32 0.5, %v414_v17  ;;  %v464_v26 = vmul.f32 %v2778_v45, %v463_v48  ;;  %vm459_vm7 = vweird.f32 %v2683_v56  ;;  %v621_v14 = vsel %vm2846_vm4, %v2654_v42, %v617_v22 }
 0x11f   : > { %813 = vmatpush.xpose.msra.mxu0 %v794_v5  ;;  %1630 = vmatpush.xpose.msra.mxu1 %v794_v5  ;;  %v375_v57 = vmul.f32 0.5, %v374_v29  ;;  %vm388_vm8 = vweird.f32 %v2727_v50  ;;  %vm499_vm11 = vweird.f32 %v2696_v8  ;;  %vm468_vm12 = vweird.f32 %v2681_v55  ;;  %vm2905_vm13 = vmor %vm458_vm1, %vm459_vm7 }
 0x120   : > { %v353_v19 = vpop.xlane.xlu1 %352  ;;  %v345_v59 = vpop.xlane.xlu0 %344  ;;  %1631 = vmatpush.xpose.msra.mxu2 %v794_v5  ;;  %1632 = vmatpush.xpose.msra.mxu3 %v794_v5  ;;  %v416_v21 = vsub.f32 1.5, %v415_v9  ;;  %v2869_v0 = vmul.f32 0.5, %v464_v26  ;;  %v789_v58 = vmul.f32 %v631_v53, %v2383_v28  ;;  %vm508_vm14 = vweird.f32 %v2736_v12  ;;  %vm2932_vm0 = vmor %vm498_vm3, %vm499_vm11 }
 0x121   : > { %v2790_v61 = vpop.eup %1798  ;;  %v2799_v4 = vmax.f32 %v353_v19, 1e-24  ;;  %v329_v52 = vpop.xlane.xlu2 %328  ;;  %v2815_v37 = vmax.f32 %v345_v59, 1e-24  ;;  %v376_v27 = vsub.f32 1.5, %v375_v57  ;;  %v457_v59 = vmul.f32 %v2683_v56, %v456_v23 }
 0x122   : > { %v2811_v3 = vmax.f32 %v329_v52, 1e-24  ;;  %v2818_v13 = vpop.eup %1800  ;;  %v383_v25 = vmul.f32 %v2790_v61, %v2727_v50  ;;  %v417_v5 = vmul.f32 %v2716_v6, %v416_v21  ;;  %v497_v62 = vmul.f32 %v2696_v8, %v496_v16 }
 0x123   : > { %1804 = vrsqrt.f32 %v2799_v4  ;;  %v2828_v35 = vpop.eup %1802  ;;  %814 = vmatpush.xpose.msra.mxu0 %v793_v36  ;;  %1633 = vmatpush.xpose.msra.mxu1 %v793_v36  ;;  %v503_v46 = vmul.f32 %v2818_v13, %v2736_v12  ;;  %v377_v9 = vmul.f32 %v2729_v2, %v376_v27  ;;  %v466_v57 = vsub.f32 1.5, %v2869_v0  ;;  %v1822_v0 = vld [vmem:[%s2248_s4 + $0x48] sm:$0xff] }
 0x124   : > { %1806 = vrsqrt.f32 %v2811_v3  ;;  %v423_v43 = vmul.f32 %v2828_v35, %v2765_v41  ;;  %1634 = vmatpush.xpose.msra.mxu2 %v793_v36  ;;  %1635 = vmatpush.xpose.msra.mxu3 %v793_v36  ;;  %v384_v7 = vmul.f32 %v2790_v61, %v383_v25  ;;  %v421_v28 = vsel %vm2876_vm9, %v2716_v6, %v417_v5 }
 0x125   : > { %1808 = vrsqrt.f32 %v2815_v37  ;;  %v504_v42 = vmul.f32 %v2818_v13, %v503_v46  ;;  %vm428_vm15 = vweird.f32 %v2765_v41  ;;  %v2926_v18 = vmul.f32 %v621_v14, %v2392_v32 }
 0x126   : > { %v424_v49 = vmul.f32 %v2828_v35, %v423_v43  ;;  %v385_v52 = vmul.f32 0.5, %v384_v7  ;;  %v461_v32 = vsel %vm2905_vm13, %v2683_v56, %v457_v59  ;;  %v536_v23 = vmul.f32 5.0, %v421_v28 }
 0x127   : > { %815 = vmatpush.xpose.msra.mxu0 %v792_v44  ;;  %1636 = vmatpush.xpose.msra.mxu1 %v792_v44  ;;  %v505_v25 = vmul.f32 0.5, %v504_v42  ;;  %v501_v56 = vsel %vm2932_vm0, %v2696_v8, %v497_v62  ;;  %v540_v16 = vmul.f32 5.0, %v461_v32  ;;  %vm389_vm1 = vweird.f32 %v2790_v61 }
 0x128   : > { %v347_v11 = vpop.xlane.xlu1 %346  ;;  %v337_v17 = vpop.xlane.xlu0 %336  ;;  %1637 = vmatpush.xpose.msra.mxu2 %v792_v44  ;;  %1638 = vmatpush.xpose.msra.mxu3 %v792_v44  ;;  %v425_v48 = vmul.f32 0.5, %v424_v49  ;;  %v381_v44 = vsel %vm2891_vm10, %v2729_v2, %v377_v9  ;;  %vm398_vm2 = vweird.f32 %v2811_v3  ;;  %vm429_vm3 = vweird.f32 %v2828_v35  ;;  %vm2981_vm5 = vmor %vm388_vm8, %vm389_vm1 }
 0x129   : > { %v2858_v47 = vpop.eup %1804  ;;  %v2861_v60 = vmax.f32 %v347_v11, 1e-24  ;;  %v2863_v51 = vmax.f32 %v337_v17, 1e-24  ;;  %v355_v29 = vpop.xlane.xlu2 %354  ;;  %v532_v46 = vmul.f32 5.0, %v381_v44  ;;  %v506_v11 = vsub.f32 1.5, %v505_v25  ;;  %vm2994_vm8 = vmor %vm428_vm15, %vm429_vm3 }
 0x12a   : > { %v2881_v54 = vpop.eup %1806  ;;  %v2884_v20 = vmax.f32 %v355_v29, 1e-24  ;;  %v513_v15 = vmul.f32 %v2858_v47, %v2799_v4  ;;  %v426_v26 = vsub.f32 1.5, %v425_v48  ;;  %v544_v49 = vmul.f32 5.0, %v501_v56 }
 0x12b   : > { %1810 = vrsqrt.f32 %v2863_v51  ;;  %v2909_v24 = vpop.eup %1808  ;;  %816 = vmatpush.xpose.msra.mxu0 %v2826_v30  ;;  %1639 = vmatpush.xpose.msra.mxu1 %v2826_v30  ;;  %v393_v36 = vmul.f32 %v2881_v54, %v2811_v3  ;;  %vm478_vm4 = vweird.f32 %v2815_v37  ;;  %vm469_vm6 = vweird.f32 %v2778_v45 }
 0x12c   : > { %1812 = vrsqrt.f32 %v2861_v60  ;;  %1640 = vmatpush.xpose.msra.mxu2 %v2826_v30  ;;  %1641 = vmatpush.xpose.msra.mxu3 %v2826_v30  ;;  %v386_v30 = vsub.f32 1.5, %v385_v52  ;;  %v514_v53 = vmul.f32 %v2858_v47, %v513_v15  ;;  %v473_v63 = vmul.f32 %v2909_v24, %v2815_v37  ;;  %vm3004_vm10 = vmor %vm468_vm12, %vm469_vm6 }
 0x12d   : > { %1814 = vrsqrt.f32 %v2884_v20  ;;  %v394_v27 = vmul.f32 %v2881_v54, %v393_v36  ;;  %v427_v19 = vmul.f32 %v2828_v35, %v426_v26  ;;  %vm518_vm7 = vweird.f32 %v2799_v4 }
 0x12e   : > { %v2968_v17 = vmul.f32 0.5, %v514_v53  ;;  %v387_v14 = vmul.f32 %v2790_v61, %v386_v30  ;;  %v467_v9 = vmul.f32 %v2778_v45, %v466_v57  ;;  %vm509_vm9 = vweird.f32 %v2818_v13 }
 0x12f   : > { %817 = vmatpush.xpose.msra.mxu0 %v2836_v10  ;;  %1642 = vmatpush.xpose.msra.mxu1 %v2836_v10  ;;  %v395_v59 = vmul.f32 0.5, %v394_v27  ;;  %v776_v52 = vmul.f32 %v536_v23, %v2407_v38  ;;  %v780_v15 = vmul.f32 %v540_v16, %v2395_v33  ;;  %v507_v41 = vmul.f32 %v2818_v13, %v506_v11  ;;  %vm3015_vm13 = vmor %vm508_vm14, %vm509_vm9  ;;  %v1824_v33 = vld [vmem:[%s2248_s4 + $0x10] sm:$0xff] }
 0x130   : > { %v339_v21 = vpop.xlane.xlu1 %338  ;;  %v331_v22 = vpop.xlane.xlu0 %330  ;;  %1643 = vmatpush.xpose.msra.mxu2 %v2836_v10  ;;  %1644 = vmatpush.xpose.msra.mxu3 %v2836_v10  ;;  %v474_v10 = vmul.f32 %v2909_v24, %v473_v63  ;;  %vm438_vm11 = vweird.f32 %v2863_v51  ;;  %v772_v28 = vmul.f32 %v532_v46, %v2410_v39  ;;  %v516_v55 = vsub.f32 1.5, %v2968_v17 }
 0x131   : > { %v2948_v43 = vmax.f32 %v339_v21, 1e-24  ;;  %v2950_v2 = vmax.f32 %v331_v22, 1e-24  ;;  %v2955_v1 = vpop.eup %1810  ;;  %v784_v62 = vmul.f32 %v544_v49, %v2398_v34  ;;  %v391_v39 = vsel %vm2981_vm5, %v2790_v61, %v387_v14 }
 0x132   : > { %v2961_v7 = vpop.eup %1812  ;;  %v433_v8 = vmul.f32 %v2955_v1, %v2863_v51  ;;  %v475_v31 = vmul.f32 0.5, %v474_v10  ;;  %v431_v12 = vsel %vm2994_vm8, %v2828_v35, %v427_v19  ;;  %v396_v36 = vsub.f32 1.5, %v395_v59  ;;  %v1820_v51 = vld [vmem:[%s2248_s4 + $0x8] sm:$0xff] }
 0x133   : > { %1816 = vrsqrt.f32 %v2948_v43  ;;  %v2972_v29 = vpop.eup %1814  ;;  %818 = vmatpush.xpose.msra.mxu0 %v789_v58  ;;  %1645 = vmatpush.xpose.msra.mxu1 %v789_v58  ;;  %v483_v42 = vmul.f32 %v2961_v7, %v2861_v60  ;;  %v471_v34 = vsel %vm3004_vm10, %v2778_v45, %v467_v9  ;;  %v511_v44 = vsel %vm3015_vm13, %v2818_v13, %v507_v41  ;;  %v1823_v59 = vld [vmem:[%s2248_s4 + $0x68] sm:$0xff] }
 0x134   : > { %1818 = vrsqrt.f32 %v2950_v2  ;;  %v434_v5 = vmul.f32 %v2955_v1, %v433_v8  ;;  %1646 = vmatpush.xpose.msra.mxu2 %v789_v58  ;;  %1647 = vmatpush.xpose.msra.mxu3 %v789_v58  ;;  %v523_v48 = vmul.f32 %v2972_v29, %v2884_v20  ;;  %vm399_vm12 = vweird.f32 %v2881_v54 }
 0x135   : > { %v484_v6 = vmul.f32 %v2961_v7, %v483_v42  ;;  %v476_v32 = vsub.f32 1.5, %v475_v31  ;;  %vm439_vm14 = vweird.f32 %v2955_v1  ;;  %v537_v63 = vmul.f32 5.0, %v431_v12  ;;  %vm3056_vm0 = vmor %vm398_vm2, %vm399_vm12  ;;  %v1826_v12 = vld [vmem:[%s2248_s4 + $0x50] sm:$0xff] }
 0x136   : > { %v435_v40 = vmul.f32 0.5, %v434_v5  ;;  %v524_v30 = vmul.f32 %v2972_v29, %v523_v48  ;;  %vm479_vm15 = vweird.f32 %v2909_v24  ;;  %v541_v21 = vmul.f32 5.0, %v471_v34  ;;  %vm3067_vm3 = vmor %vm438_vm11, %vm439_vm14  ;;  %v1821_v5 = vld [vmem:[%s2248_s4 + $0x28] sm:$0xff] }
 0x137   : > { %819 = vmatpush.xpose.msra.mxu0 %v2926_v18  ;;  %1648 = vmatpush.xpose.msra.mxu1 %v2926_v18  ;;  %v485_v13 = vmul.f32 0.5, %v484_v6  ;;  %v545_v22 = vmul.f32 5.0, %v511_v44  ;;  %vm519_vm1 = vweird.f32 %v2858_v47  ;;  %v397_v27 = vmul.f32 %v2881_v54, %v396_v36  ;;  %vm3074_vm2 = vmor %vm478_vm4, %vm479_vm15  ;;  %v1827_v6 = vld [vmem:[%s2248_s4 + $0x70] sm:$0xff] }
 0x138   : > { %1649 = vmatpush.xpose.msra.mxu2 %v2926_v18  ;;  %1650 = vmatpush.xpose.msra.mxu3 %v2926_v18  ;;  %v436_v61 = vsub.f32 1.5, %v435_v40  ;;  %v533_v18 = vmul.f32 5.0, %v391_v39  ;;  %v525_v16 = vmul.f32 0.5, %v524_v30  ;;  %v477_v11 = vmul.f32 %v2909_v24, %v476_v32  ;;  %vm3087_vm9 = vmor %vm518_vm7, %vm519_vm1 }
 0x139   : > { %v3019_v38 = vpop.eup %1816  ;;  %v517_v17 = vmul.f32 %v2858_v47, %v516_v55  ;;  %vm528_vm5 = vweird.f32 %v2884_v20  ;;  %vm529_vm6 = vweird.f32 %v2972_v29  ;;  %vm448_vm8 = vweird.f32 %v2948_v43 }
 0x13a   : > { %v3031_v57 = vpop.eup %1818  ;;  %v443_v25 = vmul.f32 %v3019_v38, %v2948_v43  ;;  %820 = vmatmul.f32.vlgmr.msra.gmra.mxu0 %v772_v28  ;;  %832 = vmatmul.f32.vlgmr.msra.gmra.mxu1 %v776_v52  ;;  %v437_v46 = vmul.f32 %v2955_v1, %v436_v61  ;;  %v773_v10 = vmul.f32 %v1820_v51, %v533_v18  ;;  %v486_v49 = vsub.f32 1.5, %v485_v13  ;;  %vm3114_vm13 = vmor %vm528_vm5, %vm529_vm6  ;;  %v1829_v18 = vld [vmem:[%s2248_s4 + $0x38] sm:$0xff] }
 0x13b   : > { %v403_v35 = vmul.f32 %v3031_v57, %v2950_v2  ;;  %844 = vmatmul.f32.vlgmr.msra.gmra.mxu2 %v780_v15  ;;  %856 = vmatmul.f32.vlgmr.msra.gmra.mxu3 %v784_v62  ;;  %v777_v14 = vmul.f32 %v1821_v5, %v537_v63  ;;  %v781_v19 = vmul.f32 %v1822_v0, %v541_v21  ;;  %v526_v52 = vsub.f32 1.5, %v525_v16  ;;  %v1825_v62 = vld [vmem:[%s2248_s4 + $0x30] sm:$0xff]  ;;  %v1830_v13 = vld [vmem:[%s2248_s4 + $0x58] sm:$0xff] }
 0x13c   : > { %v444_v53 = vmul.f32 %v3019_v38, %v443_v25  ;;  %v785_v42 = vmul.f32 %v1823_v59, %v545_v22  ;;  %v401_v40 = vsel %vm3056_vm0, %v2881_v54, %v397_v27  ;;  %v441_v4 = vsel %vm3067_vm3, %v2955_v1, %v437_v46  ;;  %v1831_v22 = vld [vmem:[%s2248_s4 + $0x78] sm:$0xff] }
 0x13d   : > { %v404_v45 = vmul.f32 %v3031_v57, %v403_v35  ;;  %vm449_vm4 = vweird.f32 %v3019_v38  ;;  %v481_v15 = vsel %vm3074_vm2, %v2909_v24, %v477_v11  ;;  %v521_v58 = vsel %vm3087_vm9, %v2858_v47, %v517_v17 }
 0x13e   : > { %v445_v26 = vmul.f32 0.5, %v444_v53  ;;  %vm408_vm7 = vweird.f32 %v2950_v2  ;;  %vm409_vm10 = vweird.f32 %v3031_v57  ;;  %vm488_vm11 = vweird.f32 %v2861_v60  ;;  %vm3121_vm14 = vmor %vm448_vm8, %vm449_vm4 }
 0x13f   : > { %v405_v56 = vmul.f32 0.5, %v404_v45  ;;  %v534_v24 = vmul.f32 5.0, %v401_v40  ;;  %v538_v47 = vmul.f32 5.0, %v441_v4  ;;  %vm489_vm12 = vweird.f32 %v2961_v7  ;;  %vm3127_vm15 = vmor %vm408_vm7, %vm409_vm10  ;;  %v1828_v45 = vld [vmem:[%s2248_s4 + $0x18] sm:$0xff] }
 0x140   : > { %v446_v50 = vsub.f32 1.5, %v445_v26  ;;  %v542_v60 = vmul.f32 5.0, %v481_v15  ;;  %v546_v1 = vmul.f32 5.0, %v521_v58  ;;  %v487_v48 = vmul.f32 %v2961_v7, %v486_v49  ;;  %vm3133_vm0 = vmor %vm488_vm11, %vm489_vm12 }
 0x141   : > { %v406_v9 = vsub.f32 1.5, %v405_v56  ;;  %v527_v28 = vmul.f32 %v2972_v29, %v526_v52  ;;  %v774_v55 = vmul.f32 %v1824_v33, %v534_v24  ;;  %v778_v39 = vmul.f32 %v1825_v62, %v538_v47 }
 0x142   : > { %823 = vmatmul.f32.gmra.mxu0 %v773_v10  ;;  %835 = vmatmul.f32.gmra.mxu1 %v777_v14  ;;  %v447_v41 = vmul.f32 %v3019_v38, %v446_v50  ;;  %v782_v36 = vmul.f32 %v1826_v12, %v542_v60  ;;  %v786_v25 = vmul.f32 %v1827_v6, %v546_v1  ;;  %v872_v26 = vstv %s1596_s9 }
 0x143   : > { %847 = vmatmul.f32.gmra.mxu2 %v781_v19  ;;  %859 = vmatmul.f32.gmra.mxu3 %v785_v42  ;;  %v407_v20 = vmul.f32 %v3031_v57, %v406_v9  ;;  %v491_v35 = vsel %vm3133_vm0, %v2961_v7, %v487_v48  ;;  %v531_v44 = vsel %vm3114_vm13, %v2972_v29, %v527_v28  ;;  %v870_v7 = vlaneseq }
 0x144   : > { %v451_v61 = vsel %vm3121_vm14, %v3019_v38, %v447_v41  ;;  %v543_v30 = vmul.f32 5.0, %v491_v35  ;;  %v547_v53 = vmul.f32 5.0, %v531_v44 }
 0x145   : > { %v411_v34 = vsel %vm3127_vm15, %v3031_v57, %v407_v20  ;;  %v539_v57 = vmul.f32 5.0, %v451_v61  ;;  %v3158_v29 = vand.u32 127, %v870_v7 }
 0x146   : > { %v535_v32 = vmul.f32 5.0, %v411_v34  ;;  %v783_v21 = vmul.f32 %v1830_v13, %v543_v30  ;;  %v787_v23 = vmul.f32 %v1831_v22, %v547_v53 }
 0x147   : > { %v779_v63 = vmul.f32 %v1829_v18, %v539_v57  ;;  %v873_v56 = vadd.s32 %v872_v26, %v3158_v29 }
 0x148   : > { %v775_v38 = vmul.f32 %v1828_v45, %v535_v32 }
 0x149   : > { %vm874_vm1 = vcmp.lt.s32.totalorder %v873_v56, 200 }
 0x14a   : > { %826 = vmatmul.f32.gmra.mxu0 %v774_v55  ;;  %838 = vmatmul.f32.gmra.mxu1 %v778_v39 }
 0x14b   : > { %850 = vmatmul.f32.gmra.mxu2 %v782_v36  ;;  %862 = vmatmul.f32.gmra.mxu3 %v786_v25 }
 0x152   : > { %829 = vmatmul.f32.gmra.mxu0 %v775_v38  ;;  %841 = vmatmul.f32.gmra.mxu1 %v779_v63 }
 0x153   : > { %853 = vmatmul.f32.gmra.mxu2 %v783_v21  ;;  %865 = vmatmul.f32.gmra.mxu3 %v787_v23 }
 0x1b7   : > { %v821_v27 = vpop.f32.mrf.mxu0  ;;  %v833_v46 = vpop.f32.mrf.mxu1 }
 0x1b8   : > { %v3162_v3 = vsel %vm874_vm1, %v821_v27, -inf  ;;  %v3165_v16 = vsel %vm874_vm1, %v833_v46, -inf }
 0x1be   : > { %v845_v11 = vpop.f32.mrf.mxu2  ;;  %v857_v8 = vpop.f32.mrf.mxu3 }
 0x1bf   : > { %v3168_v17 = vsel %vm874_vm1, %v845_v11, -inf  ;;  %v3171_v51 = vsel %vm874_vm1, %v857_v8, -inf  ;;  %v824_v10 = vpop.f32.mrf.mxu0  ;;  %v836_v37 = vpop.f32.mrf.mxu1 }
 0x1c0   : > { %v3174_v49 = vsel %vm874_vm1, %v824_v10, -inf  ;;  %v3177_v5 = vsel %vm874_vm1, %v836_v37, -inf }
 0x1c6   : > { %v848_v14 = vpop.f32.mrf.mxu2  ;;  %v860_v0 = vpop.f32.mrf.mxu3 }
 0x1c7   : > { %v3180_v19 = vsel %vm874_vm1, %v848_v14, -inf  ;;  %v3183_v59 = vsel %vm874_vm1, %v860_v0, -inf  ;;  %v827_v42 = vpop.f32.mrf.mxu0  ;;  %v839_v50 = vpop.f32.mrf.mxu1 }
 0x1c8   : > { %v3186_v9 = vsel %vm874_vm1, %v827_v42, -inf  ;;  %v3189_v40 = vsel %vm874_vm1, %v839_v50, -inf }
 0x1ce   : > { %v851_v4 = vpop.f32.mrf.mxu2  ;;  %v863_v52 = vpop.f32.mrf.mxu3 }
 0x1cf   : > { %v3192_v15 = vsel %vm874_vm1, %v851_v4, -inf  ;;  %v3195_v58 = vsel %vm874_vm1, %v863_v52, -inf  ;;  %v830_v54 = vpop.f32.mrf.mxu0  ;;  %v842_v24 = vpop.f32.mrf.mxu1 }
 0x1d0   : > { %v3198_v47 = vsel %vm874_vm1, %v830_v54, -inf  ;;  %v3201_v2 = vsel %vm874_vm1, %v842_v24, -inf }
 0x1d3   : > { %894 = sbr.rel (%p1597_p8) target bundleno = 633 (0x279), region = 44 }
 0x1d6   : > { %v854_v60 = vpop.f32.mrf.mxu2  ;;  %v866_v1 = vpop.f32.mrf.mxu3 }
 0x1d7   : > { %v3204_v20 = vsel %vm874_vm1, %v854_v60, -inf  ;;  %v3207_v41 = vsel %vm874_vm1, %v866_v1, -inf }
 0x1d8   : > { %v896_v31 = vshrl.u32 %v870_v7, 7 }
 0x1da   : > { %vm912_vm3 = vcmp.eq.s32.totalorder %v896_v31, %v3158_v29  ;;  %v900_v48 = vadd.s32 32, %v896_v31  ;;  %v898_v28 = vadd.s32 16, %v896_v31  ;;  %v897_v43 = vadd.s32 8, %v896_v31 }
 0x1db   : > { %v928_v33 = vsel %vm912_vm3, %v3162_v3, 0.0  ;;  %v901_v55 = vadd.s32 40, %v896_v31  ;;  %v899_v62 = vadd.s32 24, %v896_v31  ;;  %v902_v6 = vadd.s32 48, %v896_v31 }
 0x1dc   : > { %944 = vadd.xlane.f32.xlu0 %v928_v33  ;;  %vm916_vm2 = vcmp.eq.s32.totalorder %v900_v48, %v3158_v29  ;;  %vm914_vm5 = vcmp.eq.s32.totalorder %v898_v28, %v3158_v29  ;;  %vm913_vm6 = vcmp.eq.s32.totalorder %v897_v43, %v3158_v29  ;;  %v904_v61 = vadd.s32 64, %v896_v31 }
 0x1dd   : > { %v932_v39 = vsel %vm916_vm2, %v3165_v16, 0.0  ;;  %v930_v12 = vsel %vm914_vm5, %v3186_v9, 0.0  ;;  %vm917_vm8 = vcmp.eq.s32.totalorder %v901_v55, %v3158_v29  ;;  %vm915_vm9 = vcmp.eq.s32.totalorder %v899_v62, %v3158_v29 }
 0x1de   : > { %952 = vadd.xlane.f32.xlu2 %v932_v39  ;;  %948 = vadd.xlane.f32.xlu1 %v930_v12  ;;  %v929_v36 = vsel %vm913_vm6, %v3174_v49, 0.0  ;;  %v933_v25 = vsel %vm917_vm8, %v3177_v5, 0.0  ;;  %v931_v34 = vsel %vm915_vm9, %v3198_v47, 0.0  ;;  %v903_v35 = vadd.s32 56, %v896_v31 }
 0x1df   : > { %vm918_vm4 = vcmp.eq.s32.totalorder %v902_v6, %v3158_v29  ;;  %vm920_vm7 = vcmp.eq.s32.totalorder %v904_v61, %v3158_v29  ;;  %v905_v32 = vadd.s32 72, %v896_v31  ;;  %v907_v53 = vadd.s32 88, %v896_v31 }
 0x1e0   : > { %vm919_vm10 = vcmp.eq.s32.totalorder %v903_v35, %v3158_v29  ;;  %v934_v44 = vsel %vm918_vm4, %v3189_v40, 0.0  ;;  %v936_v57 = vsel %vm920_vm7, %v3168_v17, 0.0  ;;  %v906_v45 = vadd.s32 80, %v896_v31 }
 0x1e1   : > { %v935_v30 = vsel %vm919_vm10, %v3201_v2, 0.0  ;;  %vm921_vm11 = vcmp.eq.s32.totalorder %v905_v32, %v3158_v29  ;;  %vm923_vm13 = vcmp.eq.s32.totalorder %v907_v53, %v3158_v29  ;;  %v908_v18 = vadd.s32 96, %v896_v31 }
 0x1e2   : > { %vm922_vm12 = vcmp.eq.s32.totalorder %v906_v45, %v3158_v29  ;;  %v937_v38 = vsel %vm921_vm11, %v3180_v19, 0.0  ;;  %v939_v63 = vsel %vm923_vm13, %v3204_v20, 0.0  ;;  %v910_v21 = vadd.s32 112, %v896_v31 }
 0x1e3   : > { %v938_v13 = vsel %vm922_vm12, %v3192_v15, 0.0  ;;  %v909_v22 = vadd.s32 104, %v896_v31  ;;  %vm924_vm14 = vcmp.eq.s32.totalorder %v908_v18, %v3158_v29  ;;  %v911_v7 = vadd.s32 120, %v896_v31 }
 0x1e4   : > { %946 = vadd.xlane.f32.xlu0 %v929_v36  ;;  %vm926_vm15 = vcmp.eq.s32.totalorder %v910_v21, %v3158_v29  ;;  %v940_v23 = vsel %vm924_vm14, %v3171_v51, 0.0  ;;  %vm976_vm3 = vcmask 7168  }
 0x1e5   : > { %vm925_vm0 = vcmp.eq.s32.totalorder %v909_v22, %v3158_v29  ;;  %v942_v26 = vsel %vm926_vm15, %v3195_v58, 0.0  ;;  %vm927_vm1 = vcmp.eq.s32.totalorder %v911_v7, %v3158_v29 }
 0x1e6   : > { %954 = vadd.xlane.f32.xlu2 %v933_v25  ;;  %950 = vadd.xlane.f32.xlu1 %v931_v34  ;;  %v941_v56 = vsel %vm925_vm0, %v3183_v59, 0.0  ;;  %v943_v27 = vsel %vm927_vm1, %v3207_v41, 0.0 }
 0x1ec   : > { %956 = vadd.xlane.f32.xlu0 %v934_v44 }
 0x1ee   : > { %960 = vadd.xlane.f32.xlu2 %v936_v57  ;;  %958 = vadd.xlane.f32.xlu1 %v935_v30 }
 0x1f4   : > { %962 = vadd.xlane.f32.xlu0 %v937_v38 }
 0x1f6   : > { %966 = vadd.xlane.f32.xlu2 %v939_v63  ;;  %964 = vadd.xlane.f32.xlu1 %v938_v13 }
 0x1fc   : > { %968 = vadd.xlane.f32.xlu0 %v940_v23 }
 0x1fe   : > { %972 = vadd.xlane.f32.xlu2 %v942_v26  ;;  %970 = vadd.xlane.f32.xlu1 %v941_v56 }
 0x204   : > { %974 = vadd.xlane.f32.xlu0 %v943_v27 }
 0x24f   : > { %v945_v46 = vpop.xlane.xlu0 %944 }
 0x250   : > { %977 = vst.msk [vmem:[#allocation4] sm:$0xff] %vm976_vm3, %v945_v46 }
 0x251   : > { %v953_v11 = vpop.xlane.xlu2 %952  ;;  %v949_v8 = vpop.xlane.xlu1 %948 }
 0x252   : > { %981 = vst.msk [vmem:[#allocation4 + $0x20] sm:$0xff] %vm976_vm3, %v953_v11 }
 0x253   : > { %979 = vst.msk [vmem:[#allocation4 + $0x10] sm:$0xff] %vm976_vm3, %v949_v8 }
 0x257   : > { %v947_v10 = vpop.xlane.xlu0 %946 }
 0x258   : > { %978 = vst.msk [vmem:[#allocation4 + $0x8] sm:$0xff] %vm976_vm3, %v947_v10 }
 0x259   : > { %v955_v37 = vpop.xlane.xlu2 %954  ;;  %v951_v14 = vpop.xlane.xlu1 %950 }
 0x25a   : > { %982 = vst.msk [vmem:[#allocation4 + $0x28] sm:$0xff] %vm976_vm3, %v955_v37 }
 0x25b   : > { %980 = vst.msk [vmem:[#allocation4 + $0x18] sm:$0xff] %vm976_vm3, %v951_v14 }
 0x25f   : > { %v957_v29 = vpop.xlane.xlu0 %956 }
 0x260   : > { %983 = vst.msk [vmem:[#allocation4 + $0x30] sm:$0xff] %vm976_vm3, %v957_v29 }
 0x261   : > { %v961_v0 = vpop.xlane.xlu2 %960  ;;  %v959_v42 = vpop.xlane.xlu1 %958 }
 0x262   : > { %985 = vst.msk [vmem:[#allocation4 + $0x40] sm:$0xff] %vm976_vm3, %v961_v0 }
 0x263   : > { %984 = vst.msk [vmem:[#allocation4 + $0x38] sm:$0xff] %vm976_vm3, %v959_v42 }
 0x267   : > { %v963_v50 = vpop.xlane.xlu0 %962 }
 0x268   : > { %986 = vst.msk [vmem:[#allocation4 + $0x48] sm:$0xff] %vm976_vm3, %v963_v50 }
 0x269   : > { %v967_v4 = vpop.xlane.xlu2 %966  ;;  %v965_v52 = vpop.xlane.xlu1 %964 }
 0x26a   : > { %988 = vst.msk [vmem:[#allocation4 + $0x58] sm:$0xff] %vm976_vm3, %v967_v4 }
 0x26b   : > { %987 = vst.msk [vmem:[#allocation4 + $0x50] sm:$0xff] %vm976_vm3, %v965_v52 }
 0x26f   : > { %v969_v54 = vpop.xlane.xlu0 %968 }
 0x270   : > { %989 = vst.msk [vmem:[#allocation4 + $0x60] sm:$0xff] %vm976_vm3, %v969_v54 }
 0x271   : > { %v973_v24 = vpop.xlane.xlu2 %972  ;;  %v971_v60 = vpop.xlane.xlu1 %970 }
 0x272   : > { %991 = vst.msk [vmem:[#allocation4 + $0x70] sm:$0xff] %vm976_vm3, %v973_v24 }
 0x273   : > { %990 = vst.msk [vmem:[#allocation4 + $0x68] sm:$0xff] %vm976_vm3, %v971_v60 }
 0x277   : > { %v975_v1 = vpop.xlane.xlu0 %974 }
 0x278   : > { %992 = vst.msk [vmem:[#allocation4 + $0x78] sm:$0xff] %vm976_vm3, %v975_v1 }
 0x279 PF: > { %1013 = vmax.xlane.f32.xlu1 %v3186_v9  ;;  %1009 = vmax.xlane.f32.xlu0 %v3162_v3  ;;  %v2091_v31 = vmov 0   ;;  %v3275_v48 = vld [vmem:[#allocation2 + $0x10] sm:$0xff]  ;;  %v3277_v28 = vld [vmem:[#allocation2] sm:$0xff]  ;;  %vm1313_vm2 = vcmask 7168   ;;  %v3304_v61 = vld [vmem:[#allocation2 + $0x8] sm:$0xff]  ;;  %p1598_p9 = scmp.ne.s32.totalorder %s2069_s15, 1 }
 0x27a   : > { %1017 = vmax.xlane.f32.xlu2 %v3165_v16  ;;  %1834 = vset.pattern.permute.xlu0 %v2091_v31  ;;  %v3279_v43 = vld [vmem:[#allocation2 + $0x20] sm:$0xff]  ;;  %v3306_v35 = vld [vmem:[#allocation2 + $0x18] sm:$0xff]  ;;  %v3308_v44 = vld [vmem:[#allocation2 + $0x28] sm:$0xff] }
 0x27b   : > { %1832 = vset.pattern.permute.xlu1 %v2091_v31  ;;  %1833 = vset.pattern.permute.xlu2 %v2091_v31  ;;  %v3333_v21 = vld [vmem:[#allocation2 + $0x30] sm:$0xff]  ;;  %v3335_v22 = vld [vmem:[#allocation2 + $0x38] sm:$0xff]  ;;  %v3337_v23 = vld [vmem:[#allocation2 + $0x40] sm:$0xff] }
 0x27c   : > { %v3362_v14 = vld [vmem:[#allocation2 + $0x48] sm:$0xff]  ;;  %v3364_v29 = vld [vmem:[#allocation2 + $0x50] sm:$0xff]  ;;  %v3366_v0 = vld [vmem:[#allocation2 + $0x58] sm:$0xff] }
 0x281   : > { %1011 = vmax.xlane.f32.xlu0 %v3174_v49  ;;  %1015 = vmax.xlane.f32.xlu1 %v3198_v47 }
 0x282   : > { %1019 = vmax.xlane.f32.xlu2 %v3177_v5 }
 0x289   : > { %1021 = vmax.xlane.f32.xlu0 %v3189_v40  ;;  %1023 = vmax.xlane.f32.xlu1 %v3201_v2 }
 0x28a   : > { %1025 = vmax.xlane.f32.xlu2 %v3168_v17 }
 0x291   : > { %1027 = vmax.xlane.f32.xlu0 %v3180_v19  ;;  %1029 = vmax.xlane.f32.xlu1 %v3192_v15 }
 0x292   : > { %1031 = vmax.xlane.f32.xlu2 %v3204_v20 }
 0x299   : > { %1033 = vmax.xlane.f32.xlu0 %v3171_v51  ;;  %1035 = vmax.xlane.f32.xlu1 %v3183_v59 }
 0x29a   : > { %1037 = vmax.xlane.f32.xlu2 %v3195_v58 }
 0x2a1   : > { %1039 = vmax.xlane.f32.xlu0 %v3207_v41 }
 0x2ec   : > { %v1014_v33 = vpop.xlane.xlu1 %1013  ;;  %v1010_v55 = vpop.xlane.xlu0 %1009 }
 0x2ed   : > { %v3282_v62 = vmax.f32 %v3275_v48, %v1014_v33  ;;  %v3285_v39 = vmax.f32 %v3277_v28, %v1010_v55  ;;  %v1018_v12 = vpop.xlane.xlu2 %1017  ;;  %v3392_v33 = vld [vmem:[#allocation2 + $0x60] sm:$0xff]  ;;  %v3394_v55 = vld [vmem:[#allocation2 + $0x68] sm:$0xff] }
 0x2ee   : > { %v3288_v36 = vmax.f32 %v3279_v43, %v1018_v12  ;;  %v3396_v12 = vld [vmem:[#allocation2 + $0x70] sm:$0xff] }
 0x2ef   : > { %1332 = vst.msk [vmem:[#allocation2 + $0x10] sm:$0xff] %vm1313_vm2, %v3282_v62  ;;  %1069 = vperm.xlu0 %1834, %v3282_v62   ;;  %1059 = vperm.xlu1 %1832, %v3285_v39  }
 0x2f0   : > { %1330 = vst.msk [vmem:[#allocation2] sm:$0xff] %vm1313_vm2, %v3285_v39 }
 0x2f1   : > { %1334 = vst.msk [vmem:[#allocation2 + $0x20] sm:$0xff] %vm1313_vm2, %v3288_v36 }
 0x2f4   : > { %v1012_v32 = vpop.xlane.xlu0 %1011  ;;  %v1016_v57 = vpop.xlane.xlu1 %1015 }
 0x2f5   : > { %v3311_v30 = vmax.f32 %v3304_v61, %v1012_v32  ;;  %v1020_v53 = vpop.xlane.xlu2 %1019  ;;  %v3314_v45 = vmax.f32 %v3306_v35, %v1016_v57 }
 0x2f6   : > { %v3317_v38 = vmax.f32 %v3308_v44, %v1020_v53 }
 0x2f7   : > { %v1202_v18 = vsub.f32 %v3304_v61, %v3311_v30  ;;  %1331 = vst.msk [vmem:[#allocation2 + $0x8] sm:$0xff] %vm1313_vm2, %v3311_v30  ;;  %1064 = vperm.xlu2 %1833, %v3311_v30   ;;  %1079 = vperm.xlu1 %1832, %v3288_v36   ;;  %v3663_v61 = vsub.f32 %v3279_v43, %v3288_v36 }
 0x2f8   : > { %1335 = vst.msk [vmem:[#allocation2 + $0x28] sm:$0xff] %vm1313_vm2, %v3317_v38 }
 0x2f9   : > { %1333 = vst.msk [vmem:[#allocation2 + $0x18] sm:$0xff] %vm1313_vm2, %v3314_v45  ;;  %v1225_v30 = vmul.f32 1.442695, %v3663_v61 }
 0x2fc   : > { %v1022_v7 = vpop.xlane.xlu0 %1021  ;;  %v1024_v26 = vpop.xlane.xlu1 %1023 }
 0x2fd   : > { %v3340_v56 = vmax.f32 %v3333_v21, %v1022_v7  ;;  %v1026_v27 = vpop.xlane.xlu2 %1025  ;;  %v3343_v46 = vmax.f32 %v3335_v22, %v1024_v26 }
 0x2fe   : > { %v3346_v11 = vmax.f32 %v3337_v23, %v1026_v27 }
 0x2ff   : > { %1336 = vst.msk [vmem:[#allocation2 + $0x30] sm:$0xff] %vm1313_vm2, %v3340_v56  ;;  %1074 = vperm.xlu2 %1833, %v3314_v45   ;;  %1089 = vperm.xlu1 %1832, %v3340_v56   ;;  %v3666_v36 = vsub.f32 %v3335_v22, %v3343_v46 }
 0x300   : > { %1338 = vst.msk [vmem:[#allocation2 + $0x40] sm:$0xff] %vm1313_vm2, %v3346_v11 }
 0x301   : > { %1337 = vst.msk [vmem:[#allocation2 + $0x38] sm:$0xff] %vm1313_vm2, %v3343_v46 }
 0x304   : > { %v1028_v42 = vpop.xlane.xlu0 %1027  ;;  %v1030_v50 = vpop.xlane.xlu1 %1029 }
 0x305   : > { %v3369_v4 = vmax.f32 %v3362_v14, %v1028_v42  ;;  %v1032_v52 = vpop.xlane.xlu2 %1031  ;;  %v3372_v54 = vmax.f32 %v3364_v29, %v1030_v50 }
 0x306   : > { %v3375_v24 = vmax.f32 %v3366_v0, %v1032_v52 }
 0x307   : > { %1339 = vst.msk [vmem:[#allocation2 + $0x48] sm:$0xff] %vm1313_vm2, %v3369_v4  ;;  %1104 = vperm.xlu0 %1834, %v3369_v4   ;;  %1084 = vperm.xlu2 %1833, %v3317_v38  }
 0x308   : > { %1099 = vperm.xlu1 %1832, %v3346_v11   ;;  %1341 = vst.msk [vmem:[#allocation2 + $0x58] sm:$0xff] %vm1313_vm2, %v3375_v24 }
 0x309   : > { %1340 = vst.msk [vmem:[#allocation2 + $0x50] sm:$0xff] %vm1313_vm2, %v3372_v54 }
 0x30c   : > { %v1034_v32 = vpop.xlane.xlu0 %1033  ;;  %v1036_v57 = vpop.xlane.xlu1 %1035 }
 0x30d   : > { %v3399_v53 = vmax.f32 %v3392_v33, %v1034_v32  ;;  %v1038_v7 = vpop.xlane.xlu2 %1037  ;;  %v3402_v26 = vmax.f32 %v3394_v55, %v1036_v57  ;;  %v3422_v32 = vld [vmem:[#allocation2 + $0x78] sm:$0xff] }
 0x30e   : > { %v3405_v27 = vmax.f32 %v3396_v12, %v1038_v7 }
 0x30f   : > { %1342 = vst.msk [vmem:[#allocation2 + $0x60] sm:$0xff] %vm1313_vm2, %v3399_v53  ;;  %1119 = vperm.xlu0 %1834, %v3399_v53   ;;  %1094 = vperm.xlu2 %1833, %v3343_v46   ;;  %v3668_v46 = vsub.f32 %v3362_v14, %v3369_v4  ;;  %v1192_v14 = vld [vmem:[#allocation3 + $0x38] sm:$0xff] }
 0x310   : > { %1114 = vperm.xlu1 %1832, %v3375_v24   ;;  %1344 = vst.msk [vmem:[#allocation2 + $0x70] sm:$0xff] %vm1313_vm2, %v3405_v27 }
 0x311   : > { %1343 = vst.msk [vmem:[#allocation2 + $0x68] sm:$0xff] %vm1313_vm2, %v3402_v26 }
 0x314   : > { %v1040_v57 = vpop.xlane.xlu0 %1039 }
 0x315   : > { %v3425_v7 = vmax.f32 %v3422_v32, %v1040_v57 }
 0x317   : > { %1345 = vst.msk [vmem:[#allocation2 + $0x78] sm:$0xff] %vm1313_vm2, %v3425_v7  ;;  %1134 = vperm.xlu0 %1834, %v3425_v7   ;;  %1109 = vperm.xlu2 %1833, %v3372_v54  }
 0x318   : > { %1129 = vperm.xlu1 %1832, %v3405_v27  }
 0x31f   : > { %1124 = vperm.xlu2 %1833, %v3402_v26  }
 0x351   : > { %v1065_v52 = vpop.permute.xlu2 %1064 }
 0x352   : > { %v1138_v50 = vsub.f32 %v3174_v49, %v1065_v52 }
 0x354   : > { %v1155_v42 = vmul.f32 1.442695, %v1138_v50 }
 0x356   : > { %1835 = vpow2.f32 %v1155_v42 }
 0x359   : > { %v1075_v57 = vpop.permute.xlu2 %1074 }
 0x35a   : > { %v1140_v34 = vsub.f32 %v3198_v47, %v1075_v57 }
 0x35c   : > { %v1836_v37 = vpop.eup %1835  ;;  %v1159_v52 = vmul.f32 1.442695, %v1140_v34 }
 0x35d   : > { %1267 = vadd.xlane.f32.xlu1 %v1836_v37 }
 0x361   : > { %v1070_v31 = vpop.permute.xlu0 %1069  ;;  %v1085_v1 = vpop.permute.xlu2 %1084 }
 0x362   : > { %v1139_v60 = vsub.f32 %v3186_v9, %v1070_v31  ;;  %v1060_v13 = vpop.permute.xlu1 %1059 }
 0x363   : > { %v1137_v10 = vsub.f32 %v3162_v3, %v1060_v13  ;;  %v1142_v3 = vsub.f32 %v3177_v5, %v1085_v1 }
 0x364   : > { %v1157_v8 = vmul.f32 1.442695, %v1139_v60 }
 0x365   : > { %v1153_v63 = vmul.f32 1.442695, %v1137_v10  ;;  %v1163_v10 = vmul.f32 1.442695, %v1142_v3 }
 0x366   : > { %1837 = vpow2.f32 %v1157_v8 }
 0x367   : > { %1839 = vpow2.f32 %v1153_v63 }
 0x369   : > { %v1095_v25 = vpop.permute.xlu2 %1094 }
 0x36a   : > { %v1080_v49 = vpop.permute.xlu1 %1079  ;;  %v1144_v9 = vsub.f32 %v3201_v2, %v1095_v25 }
 0x36b   : > { %v1141_v42 = vsub.f32 %v3165_v16, %v1080_v49 }
 0x36c   : > { %v1838_v50 = vpop.eup %1837  ;;  %v1167_v8 = vmul.f32 1.442695, %v1144_v9 }
 0x36d   : > { %v1161_v37 = vmul.f32 1.442695, %v1141_v42  ;;  %1269 = vadd.xlane.f32.xlu0 %v1838_v50  ;;  %v1840_v6 = vpop.eup %1839 }
 0x36e   : > { %1265 = vadd.xlane.f32.xlu2 %v1840_v6 }
 0x36f   : > { %1841 = vpow2.f32 %v1161_v37 }
 0x370   : > { %1843 = vpow2.f32 %v1159_v52 }
 0x371   : > { %v1110_v13 = vpop.permute.xlu2 %1109  ;;  %1845 = vpow2.f32 %v1167_v8 }
 0x372   : > { %v1090_v47 = vpop.permute.xlu1 %1089  ;;  %v1147_v34 = vsub.f32 %v3192_v15, %v1110_v13 }
 0x373   : > { %v1143_v63 = vsub.f32 %v3189_v40, %v1090_v47 }
 0x374   : > { %v1173_v1 = vmul.f32 1.442695, %v1147_v34 }
 0x375   : > { %v1842_v60 = vpop.eup %1841  ;;  %v1165_v16 = vmul.f32 1.442695, %v1143_v63 }
 0x376   : > { %v1844_v31 = vpop.eup %1843  ;;  %1273 = vadd.xlane.f32.xlu1 %v1842_v60 }
 0x377   : > { %1847 = vpow2.f32 %v1165_v16  ;;  %1271 = vadd.xlane.f32.xlu2 %v1844_v31  ;;  %v1846_v40 = vpop.eup %1845 }
 0x378   : > { %1849 = vpow2.f32 %v1163_v10 }
 0x379   : > { %v1105_v2 = vpop.permute.xlu0 %1104  ;;  %v1125_v5 = vpop.permute.xlu2 %1124 }
 0x37a   : > { %v1146_v6 = vsub.f32 %v3180_v19, %v1105_v2  ;;  %v1100_v25 = vpop.permute.xlu1 %1099  ;;  %v1150_v50 = vsub.f32 %v3183_v59, %v1125_v5 }
 0x37b   : > { %v1145_v57 = vsub.f32 %v3168_v17, %v1100_v25 }
 0x37c   : > { %v1171_v49 = vmul.f32 1.442695, %v1146_v6  ;;  %v1179_v15 = vmul.f32 1.442695, %v1150_v50 }
 0x37d   : > { %v1848_v42 = vpop.eup %1847  ;;  %v1169_v52 = vmul.f32 1.442695, %v1145_v57 }
 0x37e   : > { %v1850_v37 = vpop.eup %1849  ;;  %1851 = vpow2.f32 %v1171_v49  ;;  %1279 = vadd.xlane.f32.xlu1 %v1846_v40  ;;  %1277 = vadd.xlane.f32.xlu0 %v1848_v42  ;;  %v3661_v42 = vsub.f32 %v3275_v48, %v3282_v62  ;;  %v1185_v62 = vld [vmem:[#allocation3] sm:$0xff] }
 0x37f   : > { %1853 = vpow2.f32 %v1173_v1  ;;  %1275 = vadd.xlane.f32.xlu2 %v1850_v37 }
 0x380   : > { %1855 = vpow2.f32 %v1169_v52  ;;  %v1221_v50 = vmul.f32 1.442695, %v3661_v42  ;;  %v3662_v52 = vsub.f32 %v3277_v28, %v3285_v39 }
 0x381   : > { %v1120_v19 = vpop.permute.xlu0 %1119  ;;  %1857 = vpow2.f32 %v1179_v15  ;;  %v3664_v15 = vsub.f32 %v3306_v35, %v3314_v45  ;;  %v3667_v45 = vsub.f32 %v3308_v44, %v3317_v38  ;;  %v3669_v44 = vsub.f32 %v3364_v29, %v3372_v54 }
 0x382   : > { %v1149_v9 = vsub.f32 %v3171_v51, %v1120_v19  ;;  %v1115_v3 = vpop.permute.xlu1 %1114  ;;  %v1217_v37 = vmul.f32 1.442695, %v3662_v52  ;;  %v3672_v52 = vsub.f32 %v3394_v55, %v3402_v26 }
 0x383   : > { %v1148_v17 = vsub.f32 %v3204_v20, %v1115_v3  ;;  %v1223_v19 = vmul.f32 1.442695, %v3664_v15  ;;  %v1237_v38 = vmul.f32 1.442695, %v3669_v44 }
 0x384   : > { %v1852_v13 = vpop.eup %1851  ;;  %v1177_v8 = vmul.f32 1.442695, %v1149_v9  ;;  %v1187_v9 = vld [vmem:[#allocation3 + $0x10] sm:$0xff] }
 0x385   : > { %v1854_v47 = vpop.eup %1853  ;;  %v1175_v59 = vmul.f32 1.442695, %v1148_v17 }
 0x386   : > { %v1856_v63 = vpop.eup %1855  ;;  %1859 = vpow2.f32 %v1177_v8  ;;  %1285 = vadd.xlane.f32.xlu1 %v1854_v47  ;;  %1283 = vadd.xlane.f32.xlu0 %v1852_v13  ;;  %v3665_v13 = vsub.f32 %v3333_v21, %v3340_v56  ;;  %v1231_v47 = vmul.f32 1.442695, %v3666_v36  ;;  %v1188_v21 = vld [vmem:[#allocation3 + $0x18] sm:$0xff]  ;;  %v3675_v36 = vsub.f32 %v3396_v12, %v3405_v27 }
 0x387   : > { %1861 = vpow2.f32 %v1175_v59  ;;  %1281 = vadd.xlane.f32.xlu2 %v1856_v63  ;;  %v1858_v31 = vpop.eup %1857  ;;  %v1227_v59 = vmul.f32 1.442695, %v3667_v45  ;;  %v1197_v45 = vld [vmem:[#allocation3 + $0x60] sm:$0xff] }
 0x388   : > { %v1229_v8 = vmul.f32 1.442695, %v3665_v13 }
 0x389   : > { %v1135_v10 = vpop.permute.xlu0 %1134 }
 0x38a   : > { %v1152_v60 = vsub.f32 %v3207_v41, %v1135_v10  ;;  %v1130_v16 = vpop.permute.xlu1 %1129  ;;  %v1219_v41 = vmul.f32 1.442695, %v1202_v18  ;;  %v1189_v10 = vld [vmem:[#allocation3 + $0x20] sm:$0xff] }
 0x38b   : > { %v1151_v51 = vsub.f32 %v3195_v58, %v1130_v16  ;;  %v1186_v58 = vld [vmem:[#allocation3 + $0x8] sm:$0xff] }
 0x38c   : > { %v1860_v34 = vpop.eup %1859  ;;  %v1183_v20 = vmul.f32 1.442695, %v1152_v60 }
 0x38d   : > { %v1862_v2 = vpop.eup %1861  ;;  %v1181_v6 = vmul.f32 1.442695, %v1151_v51 }
 0x38e   : > { %1863 = vpow2.f32 %v1183_v20  ;;  %1291 = vadd.xlane.f32.xlu1 %v1858_v31  ;;  %1289 = vadd.xlane.f32.xlu0 %v1860_v34  ;;  %v1235_v31 = vmul.f32 1.442695, %v3668_v46 }
 0x38f   : > { %1865 = vpow2.f32 %v1181_v6  ;;  %1287 = vadd.xlane.f32.xlu2 %v1862_v2  ;;  %v3670_v6 = vsub.f32 %v3337_v23, %v3346_v11  ;;  %v3671_v23 = vsub.f32 %v3392_v33, %v3399_v53  ;;  %v1194_v33 = vld [vmem:[#allocation3 + $0x48] sm:$0xff]  ;;  %v1195_v53 = vld [vmem:[#allocation3 + $0x50] sm:$0xff] }
 0x390   : > { %1867 = vpow2.f32 %v1219_v41  ;;  %v1191_v41 = vld [vmem:[#allocation3 + $0x30] sm:$0xff] }
 0x391   : > { %1869 = vpow2.f32 %v1221_v50  ;;  %v1241_v11 = vmul.f32 1.442695, %v3671_v23 }
 0x392   : > { %1871 = vpow2.f32 %v1217_v37  ;;  %v1243_v37 = vmul.f32 1.442695, %v3672_v52 }
 0x393   : > { %1873 = vpow2.f32 %v1225_v30 }
 0x394   : > { %v1864_v5 = vpop.eup %1863  ;;  %1875 = vpow2.f32 %v1223_v19 }
 0x395   : > { %v1866_v25 = vpop.eup %1865  ;;  %1877 = vpow2.f32 %v1229_v8 }
 0x396   : > { %1295 = vadd.xlane.f32.xlu0 %v1864_v5  ;;  %v1868_v1 = vpop.eup %1867  ;;  %1879 = vpow2.f32 %v1231_v47  ;;  %v1233_v5 = vmul.f32 1.442695, %v3670_v6  ;;  %v1245_v47 = vmul.f32 1.442695, %v3675_v36 }
 0x397   : > { %1293 = vadd.xlane.f32.xlu2 %v1866_v25  ;;  %v1250_v57 = vmul.f32 %v1868_v1, %v1186_v58  ;;  %v1870_v18 = vpop.eup %1869  ;;  %1881 = vpow2.f32 %v1227_v59  ;;  %v1190_v1 = vld [vmem:[#allocation3 + $0x28] sm:$0xff] }
 0x398   : > { %v1872_v48 = vpop.eup %1871  ;;  %v1251_v3 = vmul.f32 %v1870_v18, %v1187_v9  ;;  %1883 = vpow2.f32 %v1235_v31  ;;  %v3673_v18 = vsub.f32 %v3366_v0, %v3375_v24  ;;  %v1198_v59 = vld [vmem:[#allocation3 + $0x68] sm:$0xff]  ;;  %v1200_v31 = vld [vmem:[#allocation3 + $0x78] sm:$0xff] }
 0x399   : > { %v1249_v39 = vmul.f32 %v1872_v48, %v1185_v62  ;;  %v1874_v63 = vpop.eup %1873  ;;  %1885 = vpow2.f32 %v1237_v38  ;;  %v1193_v48 = vld [vmem:[#allocation3 + $0x40] sm:$0xff] }
 0x39a   : > { %v1876_v60 = vpop.eup %1875  ;;  %v1253_v56 = vmul.f32 %v1874_v63, %v1189_v10  ;;  %1887 = vpow2.f32 %v1233_v5  ;;  %v1239_v15 = vmul.f32 1.442695, %v3673_v18  ;;  %v1196_v10 = vld [vmem:[#allocation3 + $0x58] sm:$0xff] }
 0x39b   : > { %v1252_v16 = vmul.f32 %v1876_v60, %v1188_v21  ;;  %v1878_v2 = vpop.eup %1877  ;;  %1889 = vpow2.f32 %v1241_v11 }
 0x39c   : > { %v1880_v25 = vpop.eup %1879  ;;  %v1255_v29 = vmul.f32 %v1878_v2, %v1191_v41  ;;  %1891 = vpow2.f32 %v1243_v37 }
 0x39d   : > { %v1882_v4 = vpop.eup %1881  ;;  %v1256_v54 = vmul.f32 %v1880_v25, %v1192_v14  ;;  %1893 = vpow2.f32 %v1239_v15 }
 0x39e   : > { %v1254_v58 = vmul.f32 %v1882_v4, %v1190_v1  ;;  %v1884_v30 = vpop.eup %1883 }
 0x39f   : > { %v1886_v19 = vpop.eup %1885  ;;  %v1258_v55 = vmul.f32 %v1884_v30, %v1194_v33 }
 0x3a0   : > { %v1888_v9 = vpop.eup %1887  ;;  %v1259_v26 = vmul.f32 %v1886_v19, %v1195_v53 }
 0x3d0   : > { %v1268_v40 = vpop.xlane.xlu1 %1267 }
 0x3d1   : > { %v1298_v49 = vadd.f32 %v1268_v40, %v1250_v57 }
 0x3d3   : > { %1315 = vst.msk [vmem:[#allocation3 + $0x8] sm:$0xff] %vm1313_vm2, %v1298_v49 }
 0x3e0   : > { %v1270_v17 = vpop.xlane.xlu0 %1269 }
 0x3e1   : > { %v1299_v28 = vadd.f32 %v1270_v17, %v1251_v3  ;;  %v1266_v43 = vpop.xlane.xlu2 %1265  ;;  %v1257_v3 = vmul.f32 %v1888_v9, %v1193_v48 }
 0x3e2   : > { %v1297_v35 = vadd.f32 %v1266_v43, %v1249_v39  ;;  %v3674_v39 = vsub.f32 %v3422_v32, %v3425_v7  ;;  %v1890_v43 = vpop.eup %1889 }
 0x3e3   : > { %1316 = vst.msk [vmem:[#allocation3 + $0x10] sm:$0xff] %vm1313_vm2, %v1299_v28  ;;  %v1261_v32 = vmul.f32 %v1890_v43, %v1197_v45 }
 0x3e4   : > { %1314 = vst.msk [vmem:[#allocation3] sm:$0xff] %vm1313_vm2, %v1297_v35  ;;  %v1247_v13 = vmul.f32 1.442695, %v3674_v39  ;;  %v1892_v35 = vpop.eup %1891 }
 0x3e5   : > { %v1894_v63 = vpop.eup %1893  ;;  %v1262_v7 = vmul.f32 %v1892_v35, %v1198_v59 }
 0x3e6   : > { %1895 = vpow2.f32 %v1247_v13  ;;  %v1260_v21 = vmul.f32 %v1894_v63, %v1196_v10 }
 0x3e7   : > { %1897 = vpow2.f32 %v1245_v47 }
 0x3e9   : > { %v1274_v22 = vpop.xlane.xlu1 %1273 }
 0x3ea   : > { %v1272_v51 = vpop.xlane.xlu2 %1271  ;;  %v1301_v34 = vadd.f32 %v1274_v22, %v1253_v56 }
 0x3eb   : > { %v1300_v20 = vadd.f32 %v1272_v51, %v1252_v16 }
 0x3ec   : > { %1318 = vst.msk [vmem:[#allocation3 + $0x20] sm:$0xff] %vm1313_vm2, %v1301_v34  ;;  %v1896_v46 = vpop.eup %1895  ;;  %v1199_v34 = vld [vmem:[#allocation3 + $0x70] sm:$0xff] }
 0x3ed   : > { %1317 = vst.msk [vmem:[#allocation3 + $0x18] sm:$0xff] %vm1313_vm2, %v1300_v20  ;;  %v1898_v51 = vpop.eup %1897  ;;  %v1264_v44 = vmul.f32 %v1896_v46, %v1200_v31 }
 0x3ee   : > { %v1263_v20 = vmul.f32 %v1898_v51, %v1199_v34 }
 0x3f1   : > { %v1278_v57 = vpop.xlane.xlu0 %1277  ;;  %v1280_v40 = vpop.xlane.xlu1 %1279 }
 0x3f2   : > { %v1276_v49 = vpop.xlane.xlu2 %1275  ;;  %v1303_v42 = vadd.f32 %v1278_v57, %v1255_v29  ;;  %v1304_v50 = vadd.f32 %v1280_v40, %v1256_v54 }
 0x3f3   : > { %v1302_v61 = vadd.f32 %v1276_v49, %v1254_v58 }
 0x3f4   : > { %1320 = vst.msk [vmem:[#allocation3 + $0x30] sm:$0xff] %vm1313_vm2, %v1303_v42 }
 0x3f5   : > { %1319 = vst.msk [vmem:[#allocation3 + $0x28] sm:$0xff] %vm1313_vm2, %v1302_v61 }
 0x3f6   : > { %1321 = vst.msk [vmem:[#allocation3 + $0x38] sm:$0xff] %vm1313_vm2, %v1304_v50 }
 0x3f9   : > { %v1284_v62 = vpop.xlane.xlu0 %1283  ;;  %v1286_v0 = vpop.xlane.xlu1 %1285 }
 0x3fa   : > { %v1306_v24 = vadd.f32 %v1284_v62, %v1258_v55  ;;  %v1282_v17 = vpop.xlane.xlu2 %1281  ;;  %v1307_v28 = vadd.f32 %v1286_v0, %v1259_v26 }
 0x3fb   : > { %v1305_v8 = vadd.f32 %v1282_v17, %v1257_v3 }
 0x3fc   : > { %1323 = vst.msk [vmem:[#allocation3 + $0x48] sm:$0xff] %vm1313_vm2, %v1306_v24 }
 0x3fd   : > { %1322 = vst.msk [vmem:[#allocation3 + $0x40] sm:$0xff] %vm1313_vm2, %v1305_v8 }
 0x3fe   : > { %1324 = vst.msk [vmem:[#allocation3 + $0x50] sm:$0xff] %vm1313_vm2, %v1307_v28 }
 0x401   : > { %v1290_v60 = vpop.xlane.xlu0 %1289  ;;  %v1292_v56 = vpop.xlane.xlu1 %1291 }
 0x402   : > { %v1309_v12 = vadd.f32 %v1290_v60, %v1261_v32  ;;  %v1288_v27 = vpop.xlane.xlu2 %1287  ;;  %v1310_v16 = vadd.f32 %v1292_v56, %v1262_v7 }
 0x403   : > { %v1308_v22 = vadd.f32 %v1288_v27, %v1260_v21 }
 0x404   : > { %1326 = vst.msk [vmem:[#allocation3 + $0x60] sm:$0xff] %vm1313_vm2, %v1309_v12 }
 0x405   : > { %1325 = vst.msk [vmem:[#allocation3 + $0x58] sm:$0xff] %vm1313_vm2, %v1308_v22 }
 0x406   : > { %1327 = vst.msk [vmem:[#allocation3 + $0x68] sm:$0xff] %vm1313_vm2, %v1310_v16 }
 0x409   : > { %v1296_v38 = vpop.xlane.xlu0 %1295  ;;  %1349 = sbr.rel (%p1598_p9) target bundleno = 1068 (0x42c), region = 48 }
 0x40a   : > { %v1312_v2 = vadd.f32 %v1296_v38, %v1264_v44  ;;  %v1294_v6 = vpop.xlane.xlu2 %1293 }
 0x40b   : > { %v1311_v5 = vadd.f32 %v1294_v6, %v1263_v20 }
 0x40c   : > { %1329 = vst.msk [vmem:[#allocation3 + $0x78] sm:$0xff] %vm1313_vm2, %v1312_v2 }
 0x40d   : > { %1328 = vst.msk [vmem:[#allocation3 + $0x70] sm:$0xff] %vm1313_vm2, %v1311_v5 }
 0x40e   : > { %v1366_v25 = vld [vmem:[#allocation3] sm:$0xff]  ;;  %v1367_v41 = vld [vmem:[#allocation3 + $0x8] sm:$0xff]  ;;  %v1368_v14 = vld [vmem:[#allocation3 + $0x10] sm:$0xff] }
 0x40f   : > { %1899 = vlog2.f32 %v1366_v25  ;;  %v1369_v4 = vld [vmem:[#allocation3 + $0x18] sm:$0xff]  ;;  %v1370_v1 = vld [vmem:[#allocation3 + $0x20] sm:$0xff]  ;;  %v1371_v29 = vld [vmem:[#allocation3 + $0x28] sm:$0xff] }
 0x410   : > { %1901 = vlog2.f32 %v1367_v41  ;;  %v1372_v54 = vld [vmem:[#allocation3 + $0x30] sm:$0xff]  ;;  %v1350_v57 = vld [vmem:[#allocation2] sm:$0xff]  ;;  %v1373_v40 = vld [vmem:[#allocation3 + $0x38] sm:$0xff] }
 0x411   : > { %1903 = vlog2.f32 %v1368_v14  ;;  %v1351_v49 = vld [vmem:[#allocation2 + $0x8] sm:$0xff]  ;;  %v1374_v42 = vld [vmem:[#allocation3 + $0x40] sm:$0xff]  ;;  %v1352_v61 = vld [vmem:[#allocation2 + $0x10] sm:$0xff] }
 0x412   : > { %1905 = vlog2.f32 %v1369_v4  ;;  %v1430_v52 = vld [vmem:[#allocation4] sm:$0xff]  ;;  %v1375_v30 = vld [vmem:[#allocation3 + $0x48] sm:$0xff]  ;;  %v1353_v53 = vld [vmem:[#allocation2 + $0x18] sm:$0xff] }
 0x413   : > { %1907 = vlog2.f32 %v1370_v1  ;;  %v1431_v19 = vld [vmem:[#allocation4 + $0x8] sm:$0xff]  ;;  %v1376_v9 = vld [vmem:[#allocation3 + $0x50] sm:$0xff]  ;;  %v1354_v3 = vld [vmem:[#allocation2 + $0x20] sm:$0xff] }
 0x414   : > { %1909 = vlog2.f32 %v1371_v29  ;;  %v1432_v26 = vld [vmem:[#allocation4 + $0x10] sm:$0xff]  ;;  %v1377_v0 = vld [vmem:[#allocation3 + $0x58] sm:$0xff]  ;;  %v1355_v8 = vld [vmem:[#allocation2 + $0x28] sm:$0xff] }
 0x415   : > { %v1900_v58 = vpop.eup %1899  ;;  %1911 = vlog2.f32 %v1372_v54  ;;  %v1433_v39 = vld [vmem:[#allocation4 + $0x18] sm:$0xff]  ;;  %v1378_v43 = vld [vmem:[#allocation3 + $0x60] sm:$0xff]  ;;  %v1356_v63 = vld [vmem:[#allocation2 + $0x30] sm:$0xff] }
 0x416   : > { %v1902_v23 = vpop.eup %1901  ;;  %v1383_v11 = vmul.f32 0.6931472, %v1900_v58  ;;  %1913 = vlog2.f32 %v1373_v40  ;;  %v1434_v45 = vld [vmem:[#allocation4 + $0x20] sm:$0xff]  ;;  %v1379_v10 = vld [vmem:[#allocation3 + $0x68] sm:$0xff]  ;;  %v1357_v12 = vld [vmem:[#allocation2 + $0x38] sm:$0xff] }
 0x417   : > { %v1904_v50 = vpop.eup %1903  ;;  %v1385_v37 = vmul.f32 0.6931472, %v1902_v23  ;;  %1915 = vlog2.f32 %v1374_v42  ;;  %v1435_v21 = vld [vmem:[#allocation4 + $0x28] sm:$0xff]  ;;  %v1380_v27 = vld [vmem:[#allocation3 + $0x70] sm:$0xff]  ;;  %v1358_v34 = vld [vmem:[#allocation2 + $0x40] sm:$0xff] }
 0x418   : > { %v1906_v18 = vpop.eup %1905  ;;  %v1414_v15 = vadd.f32 %v1383_v11, %v1350_v57  ;;  %v1387_v33 = vmul.f32 0.6931472, %v1904_v50  ;;  %1917 = vlog2.f32 %v1375_v30  ;;  %v1436_v31 = vld [vmem:[#allocation4 + $0x30] sm:$0xff]  ;;  %v1381_v44 = vld [vmem:[#allocation3 + $0x78] sm:$0xff]  ;;  %v1359_v25 = vld [vmem:[#allocation2 + $0x48] sm:$0xff] }
 0x419   : > { %v1908_v48 = vpop.eup %1907  ;;  %v1415_v55 = vadd.f32 %v1385_v37, %v1351_v49  ;;  %v1389_v62 = vmul.f32 0.6931472, %v1906_v18  ;;  %1919 = vlog2.f32 %v1376_v9  ;;  %v1437_v6 = vld [vmem:[#allocation4 + $0x38] sm:$0xff]  ;;  %v1438_v1 = vld [vmem:[#allocation4 + $0x40] sm:$0xff]  ;;  %v1360_v54 = vld [vmem:[#allocation2 + $0x50] sm:$0xff] }
 0x41a   : > { %v1910_v24 = vpop.eup %1909  ;;  %v1446_v17 = vsub.f32 %v1414_v15, %v1430_v52  ;;  %v1416_v28 = vadd.f32 %v1387_v33, %v1352_v61  ;;  %v1391_v13 = vmul.f32 0.6931472, %v1908_v48  ;;  %1921 = vlog2.f32 %v1377_v0  ;;  %v1439_v23 = vld [vmem:[#allocation4 + $0x48] sm:$0xff]  ;;  %v1361_v49 = vld [vmem:[#allocation2 + $0x58] sm:$0xff]  ;;  %v1440_v37 = vld [vmem:[#allocation4 + $0x50] sm:$0xff] }
 0x41b   : > { %v1912_v36 = vpop.eup %1911  ;;  %v1447_v47 = vsub.f32 %v1415_v55, %v1431_v19  ;;  %v1417_v35 = vadd.f32 %v1389_v62, %v1353_v53  ;;  %v1393_v59 = vmul.f32 0.6931472, %v1910_v24  ;;  %1923 = vlog2.f32 %v1378_v43  ;;  %v1362_v30 = vld [vmem:[#allocation2 + $0x60] sm:$0xff]  ;;  %v1441_v33 = vld [vmem:[#allocation4 + $0x58] sm:$0xff]  ;;  %v1363_v9 = vld [vmem:[#allocation2 + $0x68] sm:$0xff] }
 0x41c   : > { %v1914_v32 = vpop.eup %1913  ;;  %1462 = vst.msk [vmem:[%s2265_s5] sm:$0xff] %vm1313_vm2, %v1446_v17  ;;  %v1448_v7 = vsub.f32 %v1416_v28, %v1432_v26  ;;  %v1418_v60 = vadd.f32 %v1391_v13, %v1354_v3  ;;  %v1395_v56 = vmul.f32 0.6931472, %v1912_v36  ;;  %1925 = vlog2.f32 %v1379_v10  ;;  %v1442_v62 = vld [vmem:[#allocation4 + $0x60] sm:$0xff]  ;;  %v1364_v0 = vld [vmem:[#allocation2 + $0x70] sm:$0xff] }
 0x41d   : > { %v1916_v16 = vpop.eup %1915  ;;  %1463 = vst.msk [vmem:[%s2265_s5 + $0x8] sm:$0xff] %vm1313_vm2, %v1447_v47  ;;  %v1449_v22 = vsub.f32 %v1417_v35, %v1433_v39  ;;  %v1419_v46 = vadd.f32 %v1393_v59, %v1355_v8  ;;  %v1397_v51 = vmul.f32 0.6931472, %v1914_v32  ;;  %1927 = vlog2.f32 %v1380_v27  ;;  %v1443_v39 = vld [vmem:[#allocation4 + $0x68] sm:$0xff]  ;;  %v1365_v8 = vld [vmem:[#allocation2 + $0x78] sm:$0xff]  ;;  %v1444_v47 = vld [vmem:[#allocation4 + $0x70] sm:$0xff] }
 0x41e   : > { %v1918_v38 = vpop.eup %1917  ;;  %1464 = vst.msk [vmem:[%s2265_s5 + $0x10] sm:$0xff] %vm1313_vm2, %v1448_v7  ;;  %v1450_v20 = vsub.f32 %v1418_v60, %v1434_v45  ;;  %v1420_v2 = vadd.f32 %v1395_v56, %v1356_v63  ;;  %v1399_v5 = vmul.f32 0.6931472, %v1916_v16  ;;  %1929 = vlog2.f32 %v1381_v44  ;;  %v1445_v63 = vld [vmem:[#allocation4 + $0x78] sm:$0xff] }
 0x41f   : > { %v1920_v41 = vpop.eup %1919  ;;  %1465 = vst.msk [vmem:[%s2265_s5 + $0x18] sm:$0xff] %vm1313_vm2, %v1449_v22  ;;  %v1451_v14 = vsub.f32 %v1419_v46, %v1435_v21  ;;  %v1421_v4 = vadd.f32 %v1397_v51, %v1357_v12  ;;  %v1401_v29 = vmul.f32 0.6931472, %v1918_v38 }
 0x420   : > { %v1922_v58 = vpop.eup %1921  ;;  %1466 = vst.msk [vmem:[%s2265_s5 + $0x20] sm:$0xff] %vm1313_vm2, %v1450_v20  ;;  %v1452_v57 = vsub.f32 %v1420_v2, %v1436_v31  ;;  %v1422_v40 = vadd.f32 %v1399_v5, %v1358_v34  ;;  %v1403_v11 = vmul.f32 0.6931472, %v1920_v41 }
 0x421   : > { %v1924_v42 = vpop.eup %1923  ;;  %1467 = vst.msk [vmem:[%s2265_s5 + $0x28] sm:$0xff] %vm1313_vm2, %v1451_v14  ;;  %v1453_v50 = vsub.f32 %v1421_v4, %v1437_v6  ;;  %v1423_v52 = vadd.f32 %v1401_v29, %v1359_v25  ;;  %v1405_v61 = vmul.f32 0.6931472, %v1922_v58 }
 0x422   : > { %v1926_v18 = vpop.eup %1925  ;;  %1468 = vst.msk [vmem:[%s2265_s5 + $0x30] sm:$0xff] %vm1313_vm2, %v1452_v57  ;;  %v1454_v15 = vsub.f32 %v1422_v40, %v1438_v1  ;;  %v1424_v19 = vadd.f32 %v1403_v11, %v1360_v54  ;;  %v1407_v53 = vmul.f32 0.6931472, %v1924_v42 }
 0x423   : > { %v1928_v48 = vpop.eup %1927  ;;  %1469 = vst.msk [vmem:[%s2265_s5 + $0x38] sm:$0xff] %vm1313_vm2, %v1453_v50  ;;  %v1455_v55 = vsub.f32 %v1423_v52, %v1439_v23  ;;  %v1425_v26 = vadd.f32 %v1405_v61, %v1361_v49  ;;  %v1409_v3 = vmul.f32 0.6931472, %v1926_v18 }
 0x424   : > { %v1930_v24 = vpop.eup %1929  ;;  %1470 = vst.msk [vmem:[%s2265_s5 + $0x40] sm:$0xff] %vm1313_vm2, %v1454_v15  ;;  %v1456_v17 = vsub.f32 %v1424_v19, %v1440_v37  ;;  %v1426_v28 = vadd.f32 %v1407_v53, %v1362_v30  ;;  %v1411_v13 = vmul.f32 0.6931472, %v1928_v48 }
 0x425   : > { %1471 = vst.msk [vmem:[%s2265_s5 + $0x48] sm:$0xff] %vm1313_vm2, %v1455_v55  ;;  %v1457_v43 = vsub.f32 %v1425_v26, %v1441_v33  ;;  %v1427_v36 = vadd.f32 %v1409_v3, %v1363_v9  ;;  %v1413_v35 = vmul.f32 0.6931472, %v1930_v24 }
 0x426   : > { %1472 = vst.msk [vmem:[%s2265_s5 + $0x50] sm:$0xff] %vm1313_vm2, %v1456_v17  ;;  %v1458_v45 = vsub.f32 %v1426_v28, %v1442_v62  ;;  %v1428_v59 = vadd.f32 %v1411_v13, %v1364_v0 }
 0x427   : > { %1473 = vst.msk [vmem:[%s2265_s5 + $0x58] sm:$0xff] %vm1313_vm2, %v1457_v43  ;;  %v1459_v10 = vsub.f32 %v1427_v36, %v1443_v39  ;;  %v1429_v32 = vadd.f32 %v1413_v35, %v1365_v8 }
 0x428   : > { %1474 = vst.msk [vmem:[%s2265_s5 + $0x60] sm:$0xff] %vm1313_vm2, %v1458_v45  ;;  %v1460_v7 = vsub.f32 %v1428_v59, %v1444_v47 }
 0x429   : > { %1475 = vst.msk [vmem:[%s2265_s5 + $0x68] sm:$0xff] %vm1313_vm2, %v1459_v10  ;;  %v1461_v60 = vsub.f32 %v1429_v32, %v1445_v63 }
 0x42a   : > { %1476 = vst.msk [vmem:[%s2265_s5 + $0x70] sm:$0xff] %vm1313_vm2, %v1460_v7 }
 0x42b   : > { %1477 = vst.msk [vmem:[%s2265_s5 + $0x78] sm:$0xff] %vm1313_vm2, %v1461_v60 }
 0x42c PF: > { %s18_s19 = sadd.s32 1, %s2085_s19   ;;  %s3676_s6 = sld [smem:[#allocation11_spill]] }
 0x42d   : > { %p15_p10 = scmp.ge.s32.totalorder %s18_s19, 6   ;;  %s3677_s27 = sld [smem:[#allocation12_spill]] }
 0x42e   : > { %s3678_s9 = smov %s2049_s10  ;;  %s3679_s10 = smov %s2053_s11 }
 0x42f   : > { %s3680_s11 = smov %s2225_s29  ;;  %s3681_s12 = smov %s2061_s13 }
 0x430   : > { %s3682_s13 = smov %s2065_s14  ;;  %s3683_s14 = smov %s2233_s7 }
 0x431   : > { %s3684_s15 = smov %s2077_s17  ;;  %s3685_s16 = smov %s2081_s18 }
 0x432   : > { %s3686_s17 = smov %s3676_s6  ;;  %17 = sbr.rel (!%p15_p10) target bundleno = 11 (0xb), region = 93 }
 0x433   : > { %s3687_s18 = smov %s3677_s27 }
 0x437   :  { %1500 = vsyncpa [#allocation6], 1 }
 0x438   :  { %1502 = vsyncpa [#allocation6 + $0x1], 1 }
 0x439   :  { %1503 = vsyncpa [#allocation8], 1 }
 0x43a   :  { %1505 = vsyncpa [#allocation8 + $0x1], 1 }

</bundles_post_ra>
